<compile_context>
chip_gen: v6e
topology: v6e:2x2x1
jax: 0.10.0
libtpu: 0.0.40
codegen_flags: <defaults>
</compile_context>

<pallas_src>
import functools

import jax
import jax.numpy as jnp
from jax import lax
from jax.experimental import pallas as pl
from jax.experimental.pallas import tpu as pltpu

_VMEM_LIMIT = 48 * 1024 * 1024   # safe on v5e/v6e (128 MiB) and v7x (64 MiB)


# --------------------------------------------------------------------------
# host-side helpers (computed once per forward)
# --------------------------------------------------------------------------

def rotary_tables(seq_len, head_dim, n_heads):
    """Full-width (seq, d_model) cos / signed-sin tables, tiled over heads."""
    half = head_dim // 2
    inv_freq = 1.0 / (10000.0 ** (jnp.arange(half, dtype=jnp.float32) / half))
    t = jnp.arange(seq_len, dtype=jnp.float32)
    freqs = jnp.einsum('i,j->ij', t, inv_freq)               # (S, half)
    cos = jnp.cos(freqs)
    sin = jnp.sin(freqs)
    cos_full = jnp.concatenate([cos, cos], axis=-1)           # (S, head_dim)
    sin_signed = jnp.concatenate([-sin, sin], axis=-1)        # (S, head_dim)
    return (jnp.tile(cos_full, (1, n_heads)),                 # (S, d_model)
            jnp.tile(sin_signed, (1, n_heads)))


def _swap_index(d_model, n_heads):
    """Column index that swaps the two halves within each head."""
    head_dim = d_model // n_heads
    idx = jnp.arange(d_model)
    j = idx % head_dim
    return jnp.where(j < head_dim // 2, idx + head_dim // 2, idx - head_dim // 2)


def pack_mha(p, n_heads):
    """Fold the rotary half-swap into the projection weights; cast MXU operands to bf16."""
    d = p['wq'].shape[0]
    sw = _swap_index(d, n_heads)
    wq_ext = jnp.concatenate([p['wq'], p['wq'][:, sw]], axis=1).astype(jnp.bfloat16)
    bq_ext = jnp.concatenate([p['bq'], p['bq'][sw]], axis=0).reshape(1, 2 * d)
    wkv_ext = jnp.concatenate([p['wk'], p['wk'][:, sw], p['wv']],
                              axis=1).astype(jnp.bfloat16)
    bkv_ext = jnp.concatenate([p['bk'], p['bk'][sw], p['bv']],
                              axis=0).reshape(1, 3 * d)
    wo_h = p['wo'].reshape(n_heads, d // n_heads, d).astype(jnp.bfloat16)
    return {'wq_ext': wq_ext, 'bq_ext': bq_ext.astype(jnp.float32),
            'wkv_ext': wkv_ext, 'bkv_ext': bkv_ext.astype(jnp.float32),
            'wo_h': wo_h, 'bo': p['bo'].reshape(1, d)}


def pack_ffn(pf):
    return {'w1': pf['w1'].astype(jnp.bfloat16),
            'b1': pf['b1'].reshape(1, -1),
            'w2': pf['w2'].astype(jnp.bfloat16),
            'b2': pf['b2'].reshape(1, -1)}


def _prep_bias(mask, B, Sq, Sk):
    """Broadcastable PyTorch-style mask -> (B, Sq, Sk) bf16 additive bias (0 / -1e10)."""
    m = jnp.asarray(mask)
    if m.ndim == 4:
        m = m[:, 0]                                           # drop head-broadcast dim
    m = jnp.broadcast_to(m.astype(bool), (B, Sq, Sk))
    return jnp.where(m, jnp.bfloat16(-1e10), jnp.bfloat16(0.0))


def _pick_tile(n, target, align):
    """Largest `align`-aligned tile <= target that divides n (else full n)."""
    if n <= target:
        return n
    t = (target // align) * align
    while t >= align:
        if n % t == 0:
            return t
        t -= align
    return n


# --------------------------------------------------------------------------
# fused MHA sub-layer kernel (flash-style, online softmax, fused Wo + residual)
# --------------------------------------------------------------------------

def _mha_kernel(x_ref, kv_ref, bias_ref, nw_ref, cosq_ref, sinq_ref,
                cosk_ref, sink_ref, wq_ref, bq_ref, wkv_ref, bkv_ref,
                wo_ref, bo_ref, o_ref, *rest,
                n_heads, head_dim, norm_kv, save_attn, eps=1e-6):
    if save_attn:
        attn_ref, q_scr, k_scr, v_scr, m_scr, l_scr, acc_scr = rest
    else:
        q_scr, k_scr, v_scr, m_scr, l_scr, acc_scr = rest

    iq = pl.program_id(1)
    ik = pl.program_id(2)
    nk = pl.num_programs(2)
    d = n_heads * head_dim
    nw = nw_ref[...]                                          # (1, d) f32

    def rms(v):
        ms = jnp.mean(v * v, axis=-1, keepdims=True)
        return v * lax.rsqrt(ms + eps) * nw

    # ---- per (batch, q-tile): Q projection + rotary once; reset online-softmax state
    @pl.when(ik == 0)
    def _():
        xq = rms(x_ref[0])                                    # (tq, d) f32
        qe = jnp.dot(xq.astype(jnp.bfloat16), wq_ref[...],
                     preferred_element_type=jnp.float32) + bq_ref[...]   # (tq, 2d)
        q_rot = qe[:, :d] * cosq_ref[...] + qe[:, d:] * sinq_ref[...]
        q_scr[...] = q_rot.astype(jnp.bfloat16)
        m_scr[...] = jnp.full(m_scr.shape, -jnp.inf, jnp.float32)
        l_scr[...] = jnp.zeros(l_scr.shape, jnp.float32)
        acc_scr[...] = jnp.zeros(acc_scr.shape, jnp.float32)

    # ---- per (batch, kv-tile), first q-tile only: K/V projection + rotary,
    #      cached in VMEM scratch and reused by every subsequent q-tile.
    @pl.when(iq == 0)
    def _():
        kv_in = kv_ref[0]                                     # (tk, d) f32
        xkv = rms(kv_in) if norm_kv else kv_in
        kve = jnp.dot(xkv.astype(jnp.bfloat16), wkv_ref[...],
                      preferred_element_type=jnp.float32) + bkv_ref[...]  # (tk, 3d)
        k_rot = kve[:, :d] * cosk_ref[...] + kve[:, d:2 * d] * sink_ref[...]
        k_scr[ik] = k_rot.astype(jnp.bfloat16)
        v_scr[ik] = kve[:, 2 * d:].astype(jnp.bfloat16)

    # ---- flash block: online softmax over this kv tile, all heads
    q_all = q_scr[...]                                        # (tq, d) bf16
    k_all = k_scr[ik]                                         # (tk, d) bf16
    v_all = v_scr[ik]                                         # (tk, d) bf16
    bias = bias_ref[0].astype(jnp.float32)                    # (tq, tk)
    inv_scale = 1.0 / float(head_dim) ** 0.5

    for h in range(n_heads):                                  # static unroll
        sl = slice(h * head_dim, (h + 1) * head_dim)
        s = lax.dot_general(q_all[:, sl], k_all[:, sl],
                            (((1,), (1,)), ((), ())),
                            preferred_element_type=jnp.float32)
        s = s * inv_scale + bias                              # (tq, tk) f32
        m_prev = m_scr[h]                                     # (tq, 1)
        m_new = jnp.maximum(m_prev, jnp.max(s, axis=-1, keepdims=True))
        alpha = jnp.exp(m_prev - m_new)
        p = jnp.exp(s - m_new)
        l_scr[h] = alpha * l_scr[h] + jnp.sum(p, axis=-1, keepdims=True)
        acc_scr[h] = alpha * acc_scr[h] + jnp.dot(
            p.astype(jnp.bfloat16), v_all[:, sl],
            preferred_element_type=jnp.float32)
        m_scr[h] = m_new
        if save_attn:                                         # single kv block in this mode
            attn_ref[0, h] = p / jnp.sum(p, axis=-1, keepdims=True)

    # ---- epilogue: per-head context through Wo (accumulated), + bias + residual
    @pl.when(ik == nk - 1)
    def _():
        o_acc = x_ref[0] + bo_ref[...]                        # (tq, d)
        for h in range(n_heads):
            ctx = acc_scr[h] / l_scr[h]                       # exact normalize
            o_acc = o_acc + jnp.dot(ctx.astype(jnp.bfloat16), wo_ref[h],
                                    preferred_element_type=jnp.float32)
        o_ref[0] = o_acc


def fused_mha(x, kv, bias, norm_w, pk, cos_q, sin_q, cos_k, sin_k,
              n_heads, *, norm_kv, save_attn):
    """x: (B,Sq,d) residual stream; kv: (B,Sk,d); bias: (B,Sq,Sk) bf16 additive mask."""
    B, Sq, d = x.shape
    Sk = kv.shape[1]
    Dh = d // n_heads

    tq = _pick_tile(Sq, 256, 8)
    tk = Sk if save_attn else _pick_tile(Sk, 512, 128)        # probs need one kv block
    nq, nk = Sq // tq, Sk // tk

    kernel = functools.partial(_mha_kernel, n_heads=n_heads, head_dim=Dh,
                               norm_kv=norm_kv, save_attn=save_attn)

    # kv-side blocks are only read at iq == 0; pin their index afterwards so the
    # pipeline does not keep re-fetching unused tiles.
    kv_idx = lambda b, iq, ik: (b, jnp.where(iq == 0, ik, 0), 0)
    ktab_idx = lambda b, iq, ik: (jnp.where(iq == 0, ik, 0), 0)

    in_specs = [
        pl.BlockSpec((1, tq, d), lambda b, iq, ik: (b, iq, 0)),       # x (Q source + residual)
        pl.BlockSpec((1, tk, d), kv_idx),                             # K/V source rows
        pl.BlockSpec((1, tq, tk), lambda b, iq, ik: (b, iq, ik)),     # additive mask bias (bf16)
        pl.BlockSpec((1, d), lambda b, iq, ik: (0, 0)),               # RMSNorm weight
        pl.BlockSpec((tq, d), lambda b, iq, ik: (iq, 0)),             # cos (Q rows)
        pl.BlockSpec((tq, d), lambda b, iq, ik: (iq, 0)),             # sin (Q rows)
        pl.BlockSpec((tk, d), ktab_idx),                              # cos (K rows)
        pl.BlockSpec((tk, d), ktab_idx),                              # sin (K rows)
        pl.BlockSpec((d, 2 * d), lambda b, iq, ik: (0, 0)),           # [Wq | Wq.P]   bf16
        pl.BlockSpec((1, 2 * d), lambda b, iq, ik: (0, 0)),
        pl.BlockSpec((d, 3 * d), lambda b, iq, ik: (0, 0)),           # [Wk | Wk.P | Wv] bf16
        pl.BlockSpec((1, 3 * d), lambda b, iq, ik: (0, 0)),
        pl.BlockSpec((n_heads, Dh, d), lambda b, iq, ik: (0, 0, 0)),  # Wo (head-major) bf16
        pl.BlockSpec((1, d), lambda b, iq, ik: (0, 0)),
    ]

    if save_attn:
        out_shape = (jax.ShapeDtypeStruct((B, Sq, d), jnp.float32),
                     jax.ShapeDtypeStruct((B, n_heads, Sq, Sk), jnp.float32))
        out_specs = (pl.BlockSpec((1, tq, d), lambda b, iq, ik: (b, iq, 0)),
                     pl.BlockSpec((1, n_heads, tq, Sk), lambda b, iq, ik: (b, 0, iq, 0)))
    else:
        out_shape = jax.ShapeDtypeStruct((B, Sq, d), jnp.float32)
        out_specs = pl.BlockSpec((1, tq, d), lambda b, iq, ik: (b, iq, 0))

    scratch_shapes = [
        pltpu.VMEM((tq, d), jnp.bfloat16),            # rotated Q for this q-tile
        pltpu.VMEM((nk, tk, d), jnp.bfloat16),        # rotated K cache (whole kv seq)
        pltpu.VMEM((nk, tk, d), jnp.bfloat16),        # V cache (whole kv seq)
        pltpu.VMEM((n_heads, tq, 1), jnp.float32),    # running max
        pltpu.VMEM((n_heads, tq, 1), jnp.float32),    # running sum
        pltpu.VMEM((n_heads, tq, Dh), jnp.float32),   # running context
    ]

    res = pl.pallas_call(
        kernel,
        out_shape=out_shape,
        grid=(B, nq, nk),
        in_specs=in_specs,
        out_specs=out_specs,
        scratch_shapes=scratch_shapes,
        compiler_params=pltpu.CompilerParams(
            dimension_semantics=("parallel", "arbitrary", "arbitrary"),
            vmem_limit_bytes=_VMEM_LIMIT),
    )(x, kv, bias, norm_w.reshape(1, d), cos_q, sin_q, cos_k, sin_k,
      pk['wq_ext'], pk['bq_ext'], pk['wkv_ext'], pk['bkv_ext'],
      pk['wo_h'], pk['bo'])

    if save_attn:
        return res[0], res[1]
    return res, None


# --------------------------------------------------------------------------
# fused FFN sub-layer kernel (RMSNorm -> W1 + ReLU -> W2 -> +residual), d_ff-tiled
# --------------------------------------------------------------------------

def _ffn_kernel(x_ref, nw_ref, w1_ref, b1_ref, w2_ref, b2_ref, o_ref,
                xn_scr, acc_scr, *, eps=1e-6):
    j = pl.program_id(1)

    @pl.when(j == 0)
    def _():
        x = x_ref[...]
        ms = jnp.mean(x * x, axis=-1, keepdims=True)
        xn_scr[...] = (x * lax.rsqrt(ms + eps) * nw_ref[...]).astype(jnp.bfloat16)
        acc_scr[...] = x + b2_ref[...]                        # residual + output bias

    h = jnp.dot(xn_scr[...], w1_ref[...],
                preferred_element_type=jnp.float32) + b1_ref[...]
    h = jnp.maximum(h, 0.0)
    acc_scr[...] += jnp.dot(h.astype(jnp.bfloat16), w2_ref[...],
                            preferred_element_type=jnp.float32)

    @pl.when(j == pl.num_programs(1) - 1)
    def _():
        o_ref[...] = acc_scr[...]


def fused_ffn(x, norm_w, pf):
    B, S, d = x.shape
    M = B * S
    d_ff = pf['w1'].shape[1]
    tm = _pick_tile(M, 512, 8)
    tf = _pick_tile(d_ff, 2048, 128)
    x2 = x.reshape(M, d)
    out = pl.pallas_call(
        _ffn_kernel,
        out_shape=jax.ShapeDtypeStruct((M, d), jnp.float32),
        grid=(M // tm, d_ff // tf),
        in_specs=[
            pl.BlockSpec((tm, d), lambda i, j: (i, 0)),
            pl.BlockSpec((1, d), lambda i, j: (0, 0)),
            pl.BlockSpec((d, tf), lambda i, j: (0, j)),       # W1 column tile (bf16)
            pl.BlockSpec((1, tf), lambda i, j: (0, j)),
            pl.BlockSpec((tf, d), lambda i, j: (j, 0)),       # W2 row tile (bf16)
            pl.BlockSpec((1, d), lambda i, j: (0, 0)),
        ],
        out_specs=pl.BlockSpec((tm, d), lambda i, j: (i, 0)),
        scratch_shapes=[pltpu.VMEM((tm, d), jnp.bfloat16),
                        pltpu.VMEM((tm, d), jnp.float32)],
        compiler_params=pltpu.CompilerParams(
            dimension_semantics=("parallel", "arbitrary"),
            vmem_limit_bytes=_VMEM_LIMIT),
    )(x2, norm_w.reshape(1, d), pf['w1'], pf['b1'], pf['w2'], pf['b2'])
    return out.reshape(B, S, d)


# --------------------------------------------------------------------------
# fused final RMSNorm + fc_out kernel (normalize once, reuse across vocab tiles)
# --------------------------------------------------------------------------

def _norm_linear_kernel(x_ref, nw_ref, w_ref, b_ref, o_ref, xn_scr, *, eps=1e-6):
    @pl.when(pl.program_id(1) == 0)
    def _():
        x = x_ref[...]
        ms = jnp.mean(x * x, axis=-1, keepdims=True)
        xn_scr[...] = (x * lax.rsqrt(ms + eps) * nw_ref[...]).astype(jnp.bfloat16)
    o_ref[...] = jnp.dot(xn_scr[...], w_ref[...],
                         preferred_element_type=jnp.float32) + b_ref[...]


def fused_rmsnorm_linear(x2, norm_w, w_bf16, b):
    M, d = x2.shape
    N = w_bf16.shape[1]
    tm = _pick_tile(M, 512, 8)
    tn = _pick_tile(N, 1024, 128)                              # lane-aligned vocab tiles
    return pl.pallas_call(
        _norm_linear_kernel,
        out_shape=jax.ShapeDtypeStruct((M, N), jnp.float32),
        grid=(M // tm, N // tn),
        in_specs=[
            pl.BlockSpec((tm, d), lambda i, j: (i, 0)),
            pl.BlockSpec((1, d), lambda i, j: (0, 0)),
            pl.BlockSpec((d, tn), lambda i, j: (0, j)),
            pl.BlockSpec((1, tn), lambda i, j: (0, j)),
        ],
        out_specs=pl.BlockSpec((tm, tn), lambda i, j: (i, j)),
        scratch_shapes=[pltpu.VMEM((tm, d), jnp.bfloat16)],
        compiler_params=pltpu.CompilerParams(
            dimension_semantics=("parallel", "arbitrary"),
            vmem_limit_bytes=_VMEM_LIMIT),
    )(x2, norm_w.reshape(1, d), w_bf16, b.reshape(1, N))


# --------------------------------------------------------------------------
# Decoder forward (matches the PyTorch `Decoder.forward`)
# --------------------------------------------------------------------------

def decoder_forward(params, trg, enc_out, dec_mask, enc_dec_mask, n_heads,
                    atten_map_save=False):
    B, St = trg.shape
    Ss = enc_out.shape[1]
    d = params['emb'].shape[1]
    Dh = d // n_heads

    # input embedding * sqrt(d_model); dropout = identity (eval mode)
    x = jnp.sqrt(jnp.float32(d)) * params['emb'][trg]           # (B, St, d)
    enc_out = enc_out.astype(jnp.float32)

    # hoisted rotary tables (shared by every layer)
    # TODO(synk): reference applies Q-length cos/sin to K as well (errors for
    # Sq != Sk cross-attention in PyTorch); K uses tables of its own length here,
    # identical to the reference whenever Sq == Sk.
    cos_t, sin_t = rotary_tables(St, Dh, n_heads)
    cos_s, sin_s = rotary_tables(Ss, Dh, n_heads)

    dec_bias = _prep_bias(dec_mask, B, St, St)
    ed_bias = _prep_bias(enc_dec_mask, B, St, Ss)

    atten_decs, atten_enc_decs = [], []
    for lp in params['layers']:
        pk_self = pack_mha(lp['self_atten'], n_heads)
        pk_cross = pack_mha(lp['cross_atten'], n_heads)
        pf = pack_ffn(lp['ff'])

        # NOTE: the reference DecoderLayer uses ONE shared RMSNorm for all three
        # sublayers, so lp['norm_w'] is reused intentionally.
        x, a_dec = fused_mha(x, x, dec_bias, lp['norm_w'], pk_self,
                             cos_t, sin_t, cos_t, sin_t, n_heads,
                             norm_kv=True, save_attn=atten_map_save)
        x, a_ed = fused_mha(x, enc_out, ed_bias, lp['norm_w'], pk_cross,
                            cos_t, sin_t, cos_s, sin_s, n_heads,
                            norm_kv=False, save_attn=atten_map_save)
        # TODO(synk): reference process_sublayer passes 4 args to FeedForward.forward
        # (would raise in PyTorch); the intended pre-norm FF residual is implemented.
        x = fused_ffn(x, lp['norm_w'], pf)
        if atten_map_save:
            atten_decs.append(a_dec[0][None])
            atten_enc_decs.append(a_ed[0][None])

    if atten_map_save:
        atten_decs = jnp.concatenate(atten_decs, axis=0)
        atten_enc_decs = jnp.concatenate(atten_enc_decs, axis=0)

    out = fused_rmsnorm_linear(x.reshape(-1, d), params['norm_w'],
                               params['fc_out_w'].astype(jnp.bfloat16),
                               params['fc_out_b'])
    return out.reshape(B, St, -1), atten_decs, atten_enc_decs


# --------------------------------------------------------------------------
# Deterministic parameter initialization
# --------------------------------------------------------------------------

def xavier_uniform(key, shape):
    fan_in, fan_out = shape[0], shape[1]
    bound = (6.0 / (fan_in + fan_out)) ** 0.5
    return jax.random.uniform(key, shape, jnp.float32, -bound, bound)


def init_mha(key, d):
    ks = jax.random.split(key, 4)
    z = jnp.zeros((d,), jnp.float32)
    return {'wq': xavier_uniform(ks[0], (d, d)), 'bq': z,
            'wk': xavier_uniform(ks[1], (d, d)), 'bk': z,
            'wv': xavier_uniform(ks[2], (d, d)), 'bv': z,
            'wo': xavier_uniform(ks[3], (d, d)), 'bo': z}


def init_ff(key, d, d_ff):
    k1, k2 = jax.random.split(key)
    return {'w1': xavier_uniform(k1, (d, d_ff)),
            'b1': jnp.zeros((d_ff,), jnp.float32),
            'w2': xavier_uniform(k2, (d_ff, d)),
            'b2': jnp.zeros((d,), jnp.float32)}


def init_decoder(key, vocab_size, d_model, n_heads, n_layers, d_ff):
    keys = jax.random.split(key, 2 + 3 * n_layers)
    ki = iter(keys)
    params = {
        'emb': xavier_uniform(next(ki), (vocab_size, d_model)),
        'layers': [],
        'norm_w': jnp.ones((d_model,), jnp.float32),
        'fc_out_w': xavier_uniform(next(ki), (d_model, vocab_size)),
        'fc_out_b': jnp.zeros((vocab_size,), jnp.float32),
    }
    for _ in range(n_layers):
        params['layers'].append({
            'self_atten': init_mha(next(ki), d_model),
            'cross_atten': init_mha(next(ki), d_model),
            'ff': init_ff(next(ki), d_model, d_ff),
            'norm_w': jnp.ones((d_model,), jnp.float32),
        })
    return params


# --------------------------------------------------------------------------

if __name__ == "__main__":
    vocab_size, max_len = 64, 16
    d_model, n_heads, n_layers, d_ff = 32, 4, 2, 64
    pad_idx = 0
    B, St, Ss = 2, 8, 8

    key = jax.random.PRNGKey(0)
    pkey, tkey, skey, ekey = jax.random.split(key, 4)
    params = init_decoder(pkey, vocab_size, d_model, n_heads, n_layers, d_ff)

    trg = jax.random.randint(tkey, (B, St), 1, vocab_size, dtype=jnp.int32)
    trg = trg.at[:, -1].set(pad_idx)                     # exercise padding mask
    src_tokens = jax.random.randint(skey, (B, Ss), 1, vocab_size, dtype=jnp.int32)
    src_tokens = src_tokens.at[:, -2:].set(pad_idx)
    enc_out = jax.random.normal(ekey, (B, Ss, d_model), jnp.float32)

    # masks as the surrounding Transformer would build them (True = masked out)
    trg_pad = (trg == pad_idx)[:, None, None, :]                       # (B,1,1,St)
    causal = ~jnp.tril(jnp.ones((St, St), dtype=bool))
    dec_mask = trg_pad | causal[None, None]                            # (B,1,St,St)
    enc_dec_mask = jnp.broadcast_to(
        (src_tokens == pad_idx)[:, None, None, :], (B, 1, St, Ss))     # (B,1,St,Ss)

    out, atten_decs, atten_enc_decs = decoder_forward(
        params, trg, enc_out, dec_mask, enc_dec_mask, n_heads)
    out = jax.block_until_ready(out)

    assert out.shape == (B, St, vocab_size)
    assert bool(jnp.all(jnp.isfinite(out)))
    print("KERNEL_OK")
</pallas_src>

<mosaic_0001>
module attributes {stable_mosaic.version = 11 : i64} {
  func.func @_mha_kernel(%arg0: i32, %arg1: i32, %arg2: i32, %arg3: memref<1x8x32xf32, #tpu.memory_space<vmem>>, %arg4: memref<1x8x32xf32, #tpu.memory_space<vmem>>, %arg5: memref<1x8x8xbf16, #tpu.memory_space<vmem>>, %arg6: memref<1x32xf32, #tpu.memory_space<vmem>>, %arg7: memref<8x32xf32, #tpu.memory_space<vmem>>, %arg8: memref<8x32xf32, #tpu.memory_space<vmem>>, %arg9: memref<8x32xf32, #tpu.memory_space<vmem>>, %arg10: memref<8x32xf32, #tpu.memory_space<vmem>>, %arg11: memref<32x64xbf16, #tpu.memory_space<vmem>>, %arg12: memref<1x64xf32, #tpu.memory_space<vmem>>, %arg13: memref<32x96xbf16, #tpu.memory_space<vmem>>, %arg14: memref<1x96xf32, #tpu.memory_space<vmem>>, %arg15: memref<4x8x32xbf16, #tpu.memory_space<vmem>>, %arg16: memref<1x32xf32, #tpu.memory_space<vmem>>, %arg17: memref<1x8x32xf32, #tpu.memory_space<vmem>>, %arg18: memref<8x32xbf16, #tpu.memory_space<vmem>>, %arg19: memref<1x8x32xbf16, #tpu.memory_space<vmem>>, %arg20: memref<1x8x32xbf16, #tpu.memory_space<vmem>>, %arg21: memref<4x8x1xf32, #tpu.memory_space<vmem>>, %arg22: memref<4x8x1xf32, #tpu.memory_space<vmem>>, %arg23: memref<4x8x8xf32, #tpu.memory_space<vmem>>) attributes {dimension_semantics = [#tpu.dimension_semantics<parallel>, #tpu.dimension_semantics<arbitrary>, #tpu.dimension_semantics<arbitrary>], iteration_bounds = array<i64: 2, 1, 1>, scalar_prefetch = 0 : i64, scratch_operands = 6 : i64, tpu.core_type = #tpu.core_type<tc>, window_params = [{transform_indices = @transform_0, window_bounds = array<i64: 1, 8, 32>}, {transform_indices = @transform_1, window_bounds = array<i64: 1, 8, 32>}, {transform_indices = @transform_2, window_bounds = array<i64: 1, 8, 8>}, {pipeline_mode = #tpu.pipeline_mode<synchronous>, transform_indices = @transform_3, window_bounds = array<i64: 1, 32>}, {transform_indices = @transform_4, window_bounds = array<i64: 8, 32>}, {transform_indices = @transform_5, window_bounds = array<i64: 8, 32>}, {transform_indices = @transform_6, window_bounds = array<i64: 8, 32>}, {transform_indices = @transform_7, window_bounds = array<i64: 8, 32>}, {pipeline_mode = #tpu.pipeline_mode<synchronous>, transform_indices = @transform_8, window_bounds = array<i64: 32, 64>}, {pipeline_mode = #tpu.pipeline_mode<synchronous>, transform_indices = @transform_9, window_bounds = array<i64: 1, 64>}, {pipeline_mode = #tpu.pipeline_mode<synchronous>, transform_indices = @transform_10, window_bounds = array<i64: 32, 96>}, {pipeline_mode = #tpu.pipeline_mode<synchronous>, transform_indices = @transform_11, window_bounds = array<i64: 1, 96>}, {pipeline_mode = #tpu.pipeline_mode<synchronous>, transform_indices = @transform_12, window_bounds = array<i64: 4, 8, 32>}, {pipeline_mode = #tpu.pipeline_mode<synchronous>, transform_indices = @transform_13, window_bounds = array<i64: 1, 32>}, {transform_indices = @transform_14, window_bounds = array<i64: 1, 8, 32>}]} {
    %c0 = arith.constant 0 : index
    %c0_0 = arith.constant 0 : index
    %0 = vector.load %arg6[%c0, %c0_0] : memref<1x32xf32, #tpu.memory_space<vmem>>, vector<1x32xf32>
    %c0_i32 = arith.constant 0 : i32
    %1 = arith.cmpi eq, %arg2, %c0_i32 : i32
    %2 = arith.extui %1 : i1 to i32
    %c0_i32_1 = arith.constant 0 : i32
    %3 = arith.cmpi ne, %2, %c0_i32_1 : i32
    scf.if %3 {
      %c0_103 = arith.constant 0 : index
      %c0_104 = arith.constant 0 : index
      %c0_105 = arith.constant 0 : index
      %176 = vector.load %arg3[%c0_103, %c0_104, %c0_105] : memref<1x8x32xf32, #tpu.memory_space<vmem>>, vector<1x8x32xf32>
      %177 = vector.shape_cast %176 : vector<1x8x32xf32> to vector<8x32xf32>
      %178 = arith.mulf %177, %177 : vector<8x32xf32>
      %cst_106 = arith.constant dense<0.000000e+00> : vector<8xf32>
      %179 = vector.multi_reduction <add>, %178, %cst_106 [1] : vector<8x32xf32> to vector<8xf32>
      %180 = vector.shape_cast %179 : vector<8xf32> to vector<8x1xf32>
      %cst_107 = arith.constant 3.200000e+01 : f32
      %181 = vector.broadcast %cst_107 : f32 to vector<8x1xf32>
      %182 = arith.divf %180, %181 : vector<8x1xf32>
      %cst_108 = arith.constant 9.99999997E-7 : f32
      %183 = vector.broadcast %cst_108 : f32 to vector<8x1xf32>
      %184 = arith.addf %182, %183 : vector<8x1xf32>
      %185 = math.rsqrt %184 : vector<8x1xf32>
      %186 = vector.broadcast %185 : vector<8x1xf32> to vector<8x32xf32>
      %187 = arith.mulf %177, %186 : vector<8x32xf32>
      %188 = vector.broadcast %0 : vector<1x32xf32> to vector<8x32xf32>
      %189 = arith.mulf %187, %188 : vector<8x32xf32>
      %190 = arith.truncf %189 : vector<8x32xf32> to vector<8x32xbf16>
      %c0_109 = arith.constant 0 : index
      %c0_110 = arith.constant 0 : index
      %191 = vector.load %arg11[%c0_109, %c0_110] : memref<32x64xbf16, #tpu.memory_space<vmem>>, vector<32x64xbf16>
      %cst_111 = arith.constant dense<0.000000e+00> : vector<8x64xf32>
      %192 = tpu.matmul %190, %191, %cst_111 {dimension_numbers = #tpu.dot_dimension_numbers<[1], [0], [0], [1], [0, 0, 1, 1], [], []>} : vector<8x32xbf16>, vector<32x64xbf16>, vector<8x64xf32> -> vector<8x64xf32>
      %c0_112 = arith.constant 0 : index
      %c0_113 = arith.constant 0 : index
      %193 = vector.load %arg12[%c0_112, %c0_113] : memref<1x64xf32, #tpu.memory_space<vmem>>, vector<1x64xf32>
      %194 = vector.broadcast %193 : vector<1x64xf32> to vector<8x64xf32>
      %195 = arith.addf %192, %194 : vector<8x64xf32>
      %196 = vector.extract_strided_slice %195 {offsets = [0, 0], sizes = [8, 32], strides = [1, 1]} : vector<8x64xf32> to vector<8x32xf32>
      %c0_114 = arith.constant 0 : index
      %c0_115 = arith.constant 0 : index
      %197 = vector.load %arg7[%c0_114, %c0_115] : memref<8x32xf32, #tpu.memory_space<vmem>>, vector<8x32xf32>
      %198 = arith.mulf %196, %197 : vector<8x32xf32>
      %199 = vector.extract_strided_slice %195 {offsets = [0, 32], sizes = [8, 32], strides = [1, 1]} : vector<8x64xf32> to vector<8x32xf32>
      %c0_116 = arith.constant 0 : index
      %c0_117 = arith.constant 0 : index
      %200 = vector.load %arg8[%c0_116, %c0_117] : memref<8x32xf32, #tpu.memory_space<vmem>>, vector<8x32xf32>
      %201 = arith.mulf %199, %200 : vector<8x32xf32>
      %202 = arith.addf %198, %201 : vector<8x32xf32>
      %203 = arith.truncf %202 : vector<8x32xf32> to vector<8x32xbf16>
      %c0_118 = arith.constant 0 : index
      %c0_119 = arith.constant 0 : index
      %204 = vector.load %arg18[%c0_118, %c0_119] : memref<8x32xbf16, #tpu.memory_space<vmem>>, vector<8x32xbf16>
      tpu.vector_store %arg18[%c0_118, %c0_119], %203 {strides = array<i32>} : memref<8x32xbf16, #tpu.memory_space<vmem>>, vector<8x32xbf16>,
      %cst_120 = arith.constant 0xFF800000 : f32
      %205 = vector.broadcast %cst_120 : f32 to vector<4x8x1xf32>
      %c0_121 = arith.constant 0 : index
      %c0_122 = arith.constant 0 : index
      %c0_123 = arith.constant 0 : index
      %206 = vector.load %arg21[%c0_121, %c0_122, %c0_123] : memref<4x8x1xf32, #tpu.memory_space<vmem>>, vector<4x8x1xf32>
      tpu.vector_store %arg21[%c0_121, %c0_122, %c0_123], %205 {strides = array<i32>} : memref<4x8x1xf32, #tpu.memory_space<vmem>>, vector<4x8x1xf32>,
      %cst_124 = arith.constant 0.000000e+00 : f32
      %207 = vector.broadcast %cst_124 : f32 to vector<4x8x1xf32>
      %c0_125 = arith.constant 0 : index
      %c0_126 = arith.constant 0 : index
      %c0_127 = arith.constant 0 : index
      %208 = vector.load %arg22[%c0_125, %c0_126, %c0_127] : memref<4x8x1xf32, #tpu.memory_space<vmem>>, vector<4x8x1xf32>
      tpu.vector_store %arg22[%c0_125, %c0_126, %c0_127], %207 {strides = array<i32>} : memref<4x8x1xf32, #tpu.memory_space<vmem>>, vector<4x8x1xf32>,
      %cst_128 = arith.constant 0.000000e+00 : f32
      %209 = vector.broadcast %cst_128 : f32 to vector<4x8x8xf32>
      %c0_129 = arith.constant 0 : index
      %c0_130 = arith.constant 0 : index
      %c0_131 = arith.constant 0 : index
      %210 = vector.load %arg23[%c0_129, %c0_130, %c0_131] : memref<4x8x8xf32, #tpu.memory_space<vmem>>, vector<4x8x8xf32>
      tpu.vector_store %arg23[%c0_129, %c0_130, %c0_131], %209 {strides = array<i32>} : memref<4x8x8xf32, #tpu.memory_space<vmem>>, vector<4x8x8xf32>,
    } else {
    }
    %c0_i32_2 = arith.constant 0 : i32
    %4 = arith.cmpi eq, %arg1, %c0_i32_2 : i32
    %5 = arith.extui %4 : i1 to i32
    %c0_i32_3 = arith.constant 0 : i32
    %6 = arith.cmpi ne, %5, %c0_i32_3 : i32
    scf.if %6 {
      %c0_103 = arith.constant 0 : index
      %c0_104 = arith.constant 0 : index
      %c0_105 = arith.constant 0 : index
      %176 = vector.load %arg4[%c0_103, %c0_104, %c0_105] : memref<1x8x32xf32, #tpu.memory_space<vmem>>, vector<1x8x32xf32>
      %177 = vector.shape_cast %176 : vector<1x8x32xf32> to vector<8x32xf32>
      %178 = arith.mulf %177, %177 : vector<8x32xf32>
      %cst_106 = arith.constant dense<0.000000e+00> : vector<8xf32>
      %179 = vector.multi_reduction <add>, %178, %cst_106 [1] : vector<8x32xf32> to vector<8xf32>
      %180 = vector.shape_cast %179 : vector<8xf32> to vector<8x1xf32>
      %cst_107 = arith.constant 3.200000e+01 : f32
      %181 = vector.broadcast %cst_107 : f32 to vector<8x1xf32>
      %182 = arith.divf %180, %181 : vector<8x1xf32>
      %cst_108 = arith.constant 9.99999997E-7 : f32
      %183 = vector.broadcast %cst_108 : f32 to vector<8x1xf32>
      %184 = arith.addf %182, %183 : vector<8x1xf32>
      %185 = math.rsqrt %184 : vector<8x1xf32>
      %186 = vector.broadcast %185 : vector<8x1xf32> to vector<8x32xf32>
      %187 = arith.mulf %177, %186 : vector<8x32xf32>
      %188 = vector.broadcast %0 : vector<1x32xf32> to vector<8x32xf32>
      %189 = arith.mulf %187, %188 : vector<8x32xf32>
      %190 = arith.truncf %189 : vector<8x32xf32> to vector<8x32xbf16>
      %c0_109 = arith.constant 0 : index
      %c0_110 = arith.constant 0 : index
      %191 = vector.load %arg13[%c0_109, %c0_110] : memref<32x96xbf16, #tpu.memory_space<vmem>>, vector<32x96xbf16>
      %cst_111 = arith.constant dense<0.000000e+00> : vector<8x96xf32>
      %192 = tpu.matmul %190, %191, %cst_111 {dimension_numbers = #tpu.dot_dimension_numbers<[1], [0], [0], [1], [0, 0, 1, 1], [], []>} : vector<8x32xbf16>, vector<32x96xbf16>, vector<8x96xf32> -> vector<8x96xf32>
      %c0_112 = arith.constant 0 : index
      %c0_113 = arith.constant 0 : index
      %193 = vector.load %arg14[%c0_112, %c0_113] : memref<1x96xf32, #tpu.memory_space<vmem>>, vector<1x96xf32>
      %194 = vector.broadcast %193 : vector<1x96xf32> to vector<8x96xf32>
      %195 = arith.addf %192, %194 : vector<8x96xf32>
      %196 = vector.extract_strided_slice %195 {offsets = [0, 0], sizes = [8, 32], strides = [1, 1]} : vector<8x96xf32> to vector<8x32xf32>
      %c0_114 = arith.constant 0 : index
      %c0_115 = arith.constant 0 : index
      %197 = vector.load %arg9[%c0_114, %c0_115] : memref<8x32xf32, #tpu.memory_space<vmem>>, vector<8x32xf32>
      %198 = arith.mulf %196, %197 : vector<8x32xf32>
      %199 = vector.extract_strided_slice %195 {offsets = [0, 32], sizes = [8, 32], strides = [1, 1]} : vector<8x96xf32> to vector<8x32xf32>
      %c0_116 = arith.constant 0 : index
      %c0_117 = arith.constant 0 : index
      %200 = vector.load %arg10[%c0_116, %c0_117] : memref<8x32xf32, #tpu.memory_space<vmem>>, vector<8x32xf32>
      %201 = arith.mulf %199, %200 : vector<8x32xf32>
      %202 = arith.addf %198, %201 : vector<8x32xf32>
      %203 = arith.truncf %202 : vector<8x32xf32> to vector<8x32xbf16>
      %204 = arith.index_cast %arg2 : i32 to index
      %c0_118 = arith.constant 0 : index
      %c0_119 = arith.constant 0 : index
      %205 = vector.load %arg19[%204, %c0_118, %c0_119] : memref<1x8x32xbf16, #tpu.memory_space<vmem>>, vector<1x8x32xbf16>
      %206 = vector.shape_cast %205 : vector<1x8x32xbf16> to vector<8x32xbf16>
      %207 = vector.shape_cast %203 : vector<8x32xbf16> to vector<1x8x32xbf16>
      tpu.vector_store %arg19[%204, %c0_118, %c0_119], %207 {strides = array<i32>} : memref<1x8x32xbf16, #tpu.memory_space<vmem>>, vector<1x8x32xbf16>,
      %208 = vector.extract_strided_slice %195 {offsets = [0, 64], sizes = [8, 32], strides = [1, 1]} : vector<8x96xf32> to vector<8x32xf32>
      %209 = arith.truncf %208 : vector<8x32xf32> to vector<8x32xbf16>
      %210 = arith.index_cast %arg2 : i32 to index
      %c0_120 = arith.constant 0 : index
      %c0_121 = arith.constant 0 : index
      %211 = vector.load %arg20[%210, %c0_120, %c0_121] : memref<1x8x32xbf16, #tpu.memory_space<vmem>>, vector<1x8x32xbf16>
      %212 = vector.shape_cast %211 : vector<1x8x32xbf16> to vector<8x32xbf16>
      %213 = vector.shape_cast %209 : vector<8x32xbf16> to vector<1x8x32xbf16>
      tpu.vector_store %arg20[%210, %c0_120, %c0_121], %213 {strides = array<i32>} : memref<1x8x32xbf16, #tpu.memory_space<vmem>>, vector<1x8x32xbf16>,
    } else {
    }
    %c0_4 = arith.constant 0 : index
    %c0_5 = arith.constant 0 : index
    %7 = vector.load %arg18[%c0_4, %c0_5] : memref<8x32xbf16, #tpu.memory_space<vmem>>, vector<8x32xbf16>
    %8 = arith.index_cast %arg2 : i32 to index
    %c0_6 = arith.constant 0 : index
    %c0_7 = arith.constant 0 : index
    %9 = vector.load %arg19[%8, %c0_6, %c0_7] : memref<1x8x32xbf16, #tpu.memory_space<vmem>>, vector<1x8x32xbf16>
    %10 = vector.shape_cast %9 : vector<1x8x32xbf16> to vector<8x32xbf16>
    %11 = arith.index_cast %arg2 : i32 to index
    %c0_8 = arith.constant 0 : index
    %c0_9 = arith.constant 0 : index
    %12 = vector.load %arg20[%11, %c0_8, %c0_9] : memref<1x8x32xbf16, #tpu.memory_space<vmem>>, vector<1x8x32xbf16>
    %13 = vector.shape_cast %12 : vector<1x8x32xbf16> to vector<8x32xbf16>
    %c0_10 = arith.constant 0 : index
    %c0_11 = arith.constant 0 : index
    %c0_12 = arith.constant 0 : index
    %14 = vector.load %arg5[%c0_10, %c0_11, %c0_12] : memref<1x8x8xbf16, #tpu.memory_space<vmem>>, vector<1x8x8xbf16>
    %15 = vector.shape_cast %14 : vector<1x8x8xbf16> to vector<8x8xbf16>
    %16 = arith.extf %15 : vector<8x8xbf16> to vector<8x8xf32>
    %17 = vector.extract_strided_slice %7 {offsets = [0, 0], sizes = [8, 8], strides = [1, 1]} : vector<8x32xbf16> to vector<8x8xbf16>
    %18 = vector.extract_strided_slice %10 {offsets = [0, 0], sizes = [8, 8], strides = [1, 1]} : vector<8x32xbf16> to vector<8x8xbf16>
    %cst = arith.constant dense<0.000000e+00> : vector<8x8xf32>
    %19 = tpu.matmul %17, %18, %cst {dimension_numbers = #tpu.dot_dimension_numbers<[1], [1], [0], [0], [0, 0, 1, 0], [], []>} : vector<8x8xbf16>, vector<8x8xbf16>, vector<8x8xf32> -> vector<8x8xf32>
    %cst_13 = arith.constant 0.353553385 : f32
    %20 = vector.broadcast %cst_13 : f32 to vector<8x8xf32>
    %21 = arith.mulf %19, %20 : vector<8x8xf32>
    %22 = arith.addf %21, %16 : vector<8x8xf32>
    %c0_14 = arith.constant 0 : index
    %c0_15 = arith.constant 0 : index
    %c0_16 = arith.constant 0 : index
    %23 = vector.load %arg21[%c0_14, %c0_15, %c0_16] : memref<4x8x1xf32, #tpu.memory_space<vmem>>, vector<1x8x1xf32>
    %24 = vector.shape_cast %23 : vector<1x8x1xf32> to vector<8x1xf32>
    %cst_17 = arith.constant dense<0xFF800000> : vector<8xf32>
    %25 = vector.multi_reduction <maximumf>, %22, %cst_17 [1] : vector<8x8xf32> to vector<8xf32>
    %26 = vector.shape_cast %25 : vector<8xf32> to vector<8x1xf32>
    %27 = arith.maximumf %24, %26 : vector<8x1xf32>
    %28 = arith.subf %24, %27 : vector<8x1xf32>
    %29 = math.exp %28 : vector<8x1xf32>
    %30 = vector.broadcast %27 : vector<8x1xf32> to vector<8x8xf32>
    %31 = arith.subf %22, %30 : vector<8x8xf32>
    %32 = math.exp %31 : vector<8x8xf32>
    %c0_18 = arith.constant 0 : index
    %c0_19 = arith.constant 0 : index
    %c0_20 = arith.constant 0 : index
    %33 = vector.load %arg22[%c0_18, %c0_19, %c0_20] : memref<4x8x1xf32, #tpu.memory_space<vmem>>, vector<1x8x1xf32>
    %34 = vector.shape_cast %33 : vector<1x8x1xf32> to vector<8x1xf32>
    %35 = arith.mulf %29, %34 : vector<8x1xf32>
    %cst_21 = arith.constant dense<0.000000e+00> : vector<8xf32>
    %36 = vector.multi_reduction <add>, %32, %cst_21 [1] : vector<8x8xf32> to vector<8xf32>
    %37 = vector.shape_cast %36 : vector<8xf32> to vector<8x1xf32>
    %38 = arith.addf %35, %37 : vector<8x1xf32>
    %c0_22 = arith.constant 0 : index
    %c0_23 = arith.constant 0 : index
    %c0_24 = arith.constant 0 : index
    %39 = vector.load %arg22[%c0_22, %c0_23, %c0_24] : memref<4x8x1xf32, #tpu.memory_space<vmem>>, vector<1x8x1xf32>
    %40 = vector.shape_cast %39 : vector<1x8x1xf32> to vector<8x1xf32>
    %41 = vector.shape_cast %38 : vector<8x1xf32> to vector<1x8x1xf32>
    tpu.vector_store %arg22[%c0_22, %c0_23, %c0_24], %41 {strides = array<i32>} : memref<4x8x1xf32, #tpu.memory_space<vmem>>, vector<1x8x1xf32>,
    %c0_25 = arith.constant 0 : index
    %c0_26 = arith.constant 0 : index
    %c0_27 = arith.constant 0 : index
    %42 = vector.load %arg23[%c0_25, %c0_26, %c0_27] : memref<4x8x8xf32, #tpu.memory_space<vmem>>, vector<1x8x8xf32>
    %43 = vector.shape_cast %42 : vector<1x8x8xf32> to vector<8x8xf32>
    %44 = vector.broadcast %29 : vector<8x1xf32> to vector<8x8xf32>
    %45 = arith.mulf %44, %43 : vector<8x8xf32>
    %46 = arith.truncf %32 : vector<8x8xf32> to vector<8x8xbf16>
    %47 = vector.extract_strided_slice %13 {offsets = [0, 0], sizes = [8, 8], strides = [1, 1]} : vector<8x32xbf16> to vector<8x8xbf16>
    %cst_28 = arith.constant dense<0.000000e+00> : vector<8x8xf32>
    %48 = tpu.matmul %46, %47, %cst_28 {dimension_numbers = #tpu.dot_dimension_numbers<[1], [0], [0], [1], [0, 0, 1, 1], [], []>} : vector<8x8xbf16>, vector<8x8xbf16>, vector<8x8xf32> -> vector<8x8xf32>
    %49 = arith.addf %45, %48 : vector<8x8xf32>
    %c0_29 = arith.constant 0 : index
    %c0_30 = arith.constant 0 : index
    %c0_31 = arith.constant 0 : index
    %50 = vector.load %arg23[%c0_29, %c0_30, %c0_31] : memref<4x8x8xf32, #tpu.memory_space<vmem>>, vector<1x8x8xf32>
    %51 = vector.shape_cast %50 : vector<1x8x8xf32> to vector<8x8xf32>
    %52 = vector.shape_cast %49 : vector<8x8xf32> to vector<1x8x8xf32>
    tpu.vector_store %arg23[%c0_29, %c0_30, %c0_31], %52 {strides = array<i32>} : memref<4x8x8xf32, #tpu.memory_space<vmem>>, vector<1x8x8xf32>,
    %c0_32 = arith.constant 0 : index
    %c0_33 = arith.constant 0 : index
    %c0_34 = arith.constant 0 : index
    %53 = vector.load %arg21[%c0_32, %c0_33, %c0_34] : memref<4x8x1xf32, #tpu.memory_space<vmem>>, vector<1x8x1xf32>
    %54 = vector.shape_cast %53 : vector<1x8x1xf32> to vector<8x1xf32>
    %55 = vector.shape_cast %27 : vector<8x1xf32> to vector<1x8x1xf32>
    tpu.vector_store %arg21[%c0_32, %c0_33, %c0_34], %55 {strides = array<i32>} : memref<4x8x1xf32, #tpu.memory_space<vmem>>, vector<1x8x1xf32>,
    %56 = vector.extract_strided_slice %7 {offsets = [0, 8], sizes = [8, 8], strides = [1, 1]} : vector<8x32xbf16> to vector<8x8xbf16>
    %57 = vector.extract_strided_slice %10 {offsets = [0, 8], sizes = [8, 8], strides = [1, 1]} : vector<8x32xbf16> to vector<8x8xbf16>
    %cst_35 = arith.constant dense<0.000000e+00> : vector<8x8xf32>
    %58 = tpu.matmul %56, %57, %cst_35 {dimension_numbers = #tpu.dot_dimension_numbers<[1], [1], [0], [0], [0, 0, 1, 0], [], []>} : vector<8x8xbf16>, vector<8x8xbf16>, vector<8x8xf32> -> vector<8x8xf32>
    %cst_36 = arith.constant 0.353553385 : f32
    %59 = vector.broadcast %cst_36 : f32 to vector<8x8xf32>
    %60 = arith.mulf %58, %59 : vector<8x8xf32>
    %61 = arith.addf %60, %16 : vector<8x8xf32>
    %c1 = arith.constant 1 : index
    %c0_37 = arith.constant 0 : index
    %c0_38 = arith.constant 0 : index
    %62 = vector.load %arg21[%c1, %c0_37, %c0_38] : memref<4x8x1xf32, #tpu.memory_space<vmem>>, vector<1x8x1xf32>
    %63 = vector.shape_cast %62 : vector<1x8x1xf32> to vector<8x1xf32>
    %cst_39 = arith.constant dense<0xFF800000> : vector<8xf32>
    %64 = vector.multi_reduction <maximumf>, %61, %cst_39 [1] : vector<8x8xf32> to vector<8xf32>
    %65 = vector.shape_cast %64 : vector<8xf32> to vector<8x1xf32>
    %66 = arith.maximumf %63, %65 : vector<8x1xf32>
    %67 = arith.subf %63, %66 : vector<8x1xf32>
    %68 = math.exp %67 : vector<8x1xf32>
    %69 = vector.broadcast %66 : vector<8x1xf32> to vector<8x8xf32>
    %70 = arith.subf %61, %69 : vector<8x8xf32>
    %71 = math.exp %70 : vector<8x8xf32>
    %c1_40 = arith.constant 1 : index
    %c0_41 = arith.constant 0 : index
    %c0_42 = arith.constant 0 : index
    %72 = vector.load %arg22[%c1_40, %c0_41, %c0_42] : memref<4x8x1xf32, #tpu.memory_space<vmem>>, vector<1x8x1xf32>
    %73 = vector.shape_cast %72 : vector<1x8x1xf32> to vector<8x1xf32>
    %74 = arith.mulf %68, %73 : vector<8x1xf32>
    %cst_43 = arith.constant dense<0.000000e+00> : vector<8xf32>
    %75 = vector.multi_reduction <add>, %71, %cst_43 [1] : vector<8x8xf32> to vector<8xf32>
    %76 = vector.shape_cast %75 : vector<8xf32> to vector<8x1xf32>
    %77 = arith.addf %74, %76 : vector<8x1xf32>
    %c1_44 = arith.constant 1 : index
    %c0_45 = arith.constant 0 : index
    %c0_46 = arith.constant 0 : index
    %78 = vector.load %arg22[%c1_44, %c0_45, %c0_46] : memref<4x8x1xf32, #tpu.memory_space<vmem>>, vector<1x8x1xf32>
    %79 = vector.shape_cast %78 : vector<1x8x1xf32> to vector<8x1xf32>
    %80 = vector.shape_cast %77 : vector<8x1xf32> to vector<1x8x1xf32>
    tpu.vector_store %arg22[%c1_44, %c0_45, %c0_46], %80 {strides = array<i32>} : memref<4x8x1xf32, #tpu.memory_space<vmem>>, vector<1x8x1xf32>,
    %c1_47 = arith.constant 1 : index
    %c0_48 = arith.constant 0 : index
    %c0_49 = arith.constant 0 : index
    %81 = vector.load %arg23[%c1_47, %c0_48, %c0_49] : memref<4x8x8xf32, #tpu.memory_space<vmem>>, vector<1x8x8xf32>
    %82 = vector.shape_cast %81 : vector<1x8x8xf32> to vector<8x8xf32>
    %83 = vector.broadcast %68 : vector<8x1xf32> to vector<8x8xf32>
    %84 = arith.mulf %83, %82 : vector<8x8xf32>
    %85 = arith.truncf %71 : vector<8x8xf32> to vector<8x8xbf16>
    %86 = vector.extract_strided_slice %13 {offsets = [0, 8], sizes = [8, 8], strides = [1, 1]} : vector<8x32xbf16> to vector<8x8xbf16>
    %cst_50 = arith.constant dense<0.000000e+00> : vector<8x8xf32>
    %87 = tpu.matmul %85, %86, %cst_50 {dimension_numbers = #tpu.dot_dimension_numbers<[1], [0], [0], [1], [0, 0, 1, 1], [], []>} : vector<8x8xbf16>, vector<8x8xbf16>, vector<8x8xf32> -> vector<8x8xf32>
    %88 = arith.addf %84, %87 : vector<8x8xf32>
    %c1_51 = arith.constant 1 : index
    %c0_52 = arith.constant 0 : index
    %c0_53 = arith.constant 0 : index
    %89 = vector.load %arg23[%c1_51, %c0_52, %c0_53] : memref<4x8x8xf32, #tpu.memory_space<vmem>>, vector<1x8x8xf32>
    %90 = vector.shape_cast %89 : vector<1x8x8xf32> to vector<8x8xf32>
    %91 = vector.shape_cast %88 : vector<8x8xf32> to vector<1x8x8xf32>
    tpu.vector_store %arg23[%c1_51, %c0_52, %c0_53], %91 {strides = array<i32>} : memref<4x8x8xf32, #tpu.memory_space<vmem>>, vector<1x8x8xf32>,
    %c1_54 = arith.constant 1 : index
    %c0_55 = arith.constant 0 : index
    %c0_56 = arith.constant 0 : index
    %92 = vector.load %arg21[%c1_54, %c0_55, %c0_56] : memref<4x8x1xf32, #tpu.memory_space<vmem>>, vector<1x8x1xf32>
    %93 = vector.shape_cast %92 : vector<1x8x1xf32> to vector<8x1xf32>
    %94 = vector.shape_cast %66 : vector<8x1xf32> to vector<1x8x1xf32>
    tpu.vector_store %arg21[%c1_54, %c0_55, %c0_56], %94 {strides = array<i32>} : memref<4x8x1xf32, #tpu.memory_space<vmem>>, vector<1x8x1xf32>,
    %95 = vector.extract_strided_slice %7 {offsets = [0, 16], sizes = [8, 8], strides = [1, 1]} : vector<8x32xbf16> to vector<8x8xbf16>
    %96 = vector.extract_strided_slice %10 {offsets = [0, 16], sizes = [8, 8], strides = [1, 1]} : vector<8x32xbf16> to vector<8x8xbf16>
    %cst_57 = arith.constant dense<0.000000e+00> : vector<8x8xf32>
    %97 = tpu.matmul %95, %96, %cst_57 {dimension_numbers = #tpu.dot_dimension_numbers<[1], [1], [0], [0], [0, 0, 1, 0], [], []>} : vector<8x8xbf16>, vector<8x8xbf16>, vector<8x8xf32> -> vector<8x8xf32>
    %cst_58 = arith.constant 0.353553385 : f32
    %98 = vector.broadcast %cst_58 : f32 to vector<8x8xf32>
    %99 = arith.mulf %97, %98 : vector<8x8xf32>
    %100 = arith.addf %99, %16 : vector<8x8xf32>
    %c2 = arith.constant 2 : index
    %c0_59 = arith.constant 0 : index
    %c0_60 = arith.constant 0 : index
    %101 = vector.load %arg21[%c2, %c0_59, %c0_60] : memref<4x8x1xf32, #tpu.memory_space<vmem>>, vector<1x8x1xf32>
    %102 = vector.shape_cast %101 : vector<1x8x1xf32> to vector<8x1xf32>
    %cst_61 = arith.constant dense<0xFF800000> : vector<8xf32>
    %103 = vector.multi_reduction <maximumf>, %100, %cst_61 [1] : vector<8x8xf32> to vector<8xf32>
    %104 = vector.shape_cast %103 : vector<8xf32> to vector<8x1xf32>
    %105 = arith.maximumf %102, %104 : vector<8x1xf32>
    %106 = arith.subf %102, %105 : vector<8x1xf32>
    %107 = math.exp %106 : vector<8x1xf32>
    %108 = vector.broadcast %105 : vector<8x1xf32> to vector<8x8xf32>
    %109 = arith.subf %100, %108 : vector<8x8xf32>
    %110 = math.exp %109 : vector<8x8xf32>
    %c2_62 = arith.constant 2 : index
    %c0_63 = arith.constant 0 : index
    %c0_64 = arith.constant 0 : index
    %111 = vector.load %arg22[%c2_62, %c0_63, %c0_64] : memref<4x8x1xf32, #tpu.memory_space<vmem>>, vector<1x8x1xf32>
    %112 = vector.shape_cast %111 : vector<1x8x1xf32> to vector<8x1xf32>
    %113 = arith.mulf %107, %112 : vector<8x1xf32>
    %cst_65 = arith.constant dense<0.000000e+00> : vector<8xf32>
    %114 = vector.multi_reduction <add>, %110, %cst_65 [1] : vector<8x8xf32> to vector<8xf32>
    %115 = vector.shape_cast %114 : vector<8xf32> to vector<8x1xf32>
    %116 = arith.addf %113, %115 : vector<8x1xf32>
    %c2_66 = arith.constant 2 : index
    %c0_67 = arith.constant 0 : index
    %c0_68 = arith.constant 0 : index
    %117 = vector.load %arg22[%c2_66, %c0_67, %c0_68] : memref<4x8x1xf32, #tpu.memory_space<vmem>>, vector<1x8x1xf32>
    %118 = vector.shape_cast %117 : vector<1x8x1xf32> to vector<8x1xf32>
    %119 = vector.shape_cast %116 : vector<8x1xf32> to vector<1x8x1xf32>
    tpu.vector_store %arg22[%c2_66, %c0_67, %c0_68], %119 {strides = array<i32>} : memref<4x8x1xf32, #tpu.memory_space<vmem>>, vector<1x8x1xf32>,
    %c2_69 = arith.constant 2 : index
    %c0_70 = arith.constant 0 : index
    %c0_71 = arith.constant 0 : index
    %120 = vector.load %arg23[%c2_69, %c0_70, %c0_71] : memref<4x8x8xf32, #tpu.memory_space<vmem>>, vector<1x8x8xf32>
    %121 = vector.shape_cast %120 : vector<1x8x8xf32> to vector<8x8xf32>
    %122 = vector.broadcast %107 : vector<8x1xf32> to vector<8x8xf32>
    %123 = arith.mulf %122, %121 : vector<8x8xf32>
    %124 = arith.truncf %110 : vector<8x8xf32> to vector<8x8xbf16>
    %125 = vector.extract_strided_slice %13 {offsets = [0, 16], sizes = [8, 8], strides = [1, 1]} : vector<8x32xbf16> to vector<8x8xbf16>
    %cst_72 = arith.constant dense<0.000000e+00> : vector<8x8xf32>
    %126 = tpu.matmul %124, %125, %cst_72 {dimension_numbers = #tpu.dot_dimension_numbers<[1], [0], [0], [1], [0, 0, 1, 1], [], []>} : vector<8x8xbf16>, vector<8x8xbf16>, vector<8x8xf32> -> vector<8x8xf32>
    %127 = arith.addf %123, %126 : vector<8x8xf32>
    %c2_73 = arith.constant 2 : index
    %c0_74 = arith.constant 0 : index
    %c0_75 = arith.constant 0 : index
    %128 = vector.load %arg23[%c2_73, %c0_74, %c0_75] : memref<4x8x8xf32, #tpu.memory_space<vmem>>, vector<1x8x8xf32>
    %129 = vector.shape_cast %128 : vector<1x8x8xf32> to vector<8x8xf32>
    %130 = vector.shape_cast %127 : vector<8x8xf32> to vector<1x8x8xf32>
    tpu.vector_store %arg23[%c2_73, %c0_74, %c0_75], %130 {strides = array<i32>} : memref<4x8x8xf32, #tpu.memory_space<vmem>>, vector<1x8x8xf32>,
    %c2_76 = arith.constant 2 : index
    %c0_77 = arith.constant 0 : index
    %c0_78 = arith.constant 0 : index
    %131 = vector.load %arg21[%c2_76, %c0_77, %c0_78] : memref<4x8x1xf32, #tpu.memory_space<vmem>>, vector<1x8x1xf32>
    %132 = vector.shape_cast %131 : vector<1x8x1xf32> to vector<8x1xf32>
    %133 = vector.shape_cast %105 : vector<8x1xf32> to vector<1x8x1xf32>
    tpu.vector_store %arg21[%c2_76, %c0_77, %c0_78], %133 {strides = array<i32>} : memref<4x8x1xf32, #tpu.memory_space<vmem>>, vector<1x8x1xf32>,
    %134 = vector.extract_strided_slice %7 {offsets = [0, 24], sizes = [8, 8], strides = [1, 1]} : vector<8x32xbf16> to vector<8x8xbf16>
    %135 = vector.extract_strided_slice %10 {offsets = [0, 24], sizes = [8, 8], strides = [1, 1]} : vector<8x32xbf16> to vector<8x8xbf16>
    %cst_79 = arith.constant dense<0.000000e+00> : vector<8x8xf32>
    %136 = tpu.matmul %134, %135, %cst_79 {dimension_numbers = #tpu.dot_dimension_numbers<[1], [1], [0], [0], [0, 0, 1, 0], [], []>} : vector<8x8xbf16>, vector<8x8xbf16>, vector<8x8xf32> -> vector<8x8xf32>
    %cst_80 = arith.constant 0.353553385 : f32
    %137 = vector.broadcast %cst_80 : f32 to vector<8x8xf32>
    %138 = arith.mulf %136, %137 : vector<8x8xf32>
    %139 = arith.addf %138, %16 : vector<8x8xf32>
    %c3 = arith.constant 3 : index
    %c0_81 = arith.constant 0 : index
    %c0_82 = arith.constant 0 : index
    %140 = vector.load %arg21[%c3, %c0_81, %c0_82] : memref<4x8x1xf32, #tpu.memory_space<vmem>>, vector<1x8x1xf32>
    %141 = vector.shape_cast %140 : vector<1x8x1xf32> to vector<8x1xf32>
    %cst_83 = arith.constant dense<0xFF800000> : vector<8xf32>
    %142 = vector.multi_reduction <maximumf>, %139, %cst_83 [1] : vector<8x8xf32> to vector<8xf32>
    %143 = vector.shape_cast %142 : vector<8xf32> to vector<8x1xf32>
    %144 = arith.maximumf %141, %143 : vector<8x1xf32>
    %145 = arith.subf %141, %144 : vector<8x1xf32>
    %146 = math.exp %145 : vector<8x1xf32>
    %147 = vector.broadcast %144 : vector<8x1xf32> to vector<8x8xf32>
    %148 = arith.subf %139, %147 : vector<8x8xf32>
    %149 = math.exp %148 : vector<8x8xf32>
    %c3_84 = arith.constant 3 : index
    %c0_85 = arith.constant 0 : index
    %c0_86 = arith.constant 0 : index
    %150 = vector.load %arg22[%c3_84, %c0_85, %c0_86] : memref<4x8x1xf32, #tpu.memory_space<vmem>>, vector<1x8x1xf32>
    %151 = vector.shape_cast %150 : vector<1x8x1xf32> to vector<8x1xf32>
    %152 = arith.mulf %146, %151 : vector<8x1xf32>
    %cst_87 = arith.constant dense<0.000000e+00> : vector<8xf32>
    %153 = vector.multi_reduction <add>, %149, %cst_87 [1] : vector<8x8xf32> to vector<8xf32>
    %154 = vector.shape_cast %153 : vector<8xf32> to vector<8x1xf32>
    %155 = arith.addf %152, %154 : vector<8x1xf32>
    %c3_88 = arith.constant 3 : index
    %c0_89 = arith.constant 0 : index
    %c0_90 = arith.constant 0 : index
    %156 = vector.load %arg22[%c3_88, %c0_89, %c0_90] : memref<4x8x1xf32, #tpu.memory_space<vmem>>, vector<1x8x1xf32>
    %157 = vector.shape_cast %156 : vector<1x8x1xf32> to vector<8x1xf32>
    %158 = vector.shape_cast %155 : vector<8x1xf32> to vector<1x8x1xf32>
    tpu.vector_store %arg22[%c3_88, %c0_89, %c0_90], %158 {strides = array<i32>} : memref<4x8x1xf32, #tpu.memory_space<vmem>>, vector<1x8x1xf32>,
    %c3_91 = arith.constant 3 : index
    %c0_92 = arith.constant 0 : index
    %c0_93 = arith.constant 0 : index
    %159 = vector.load %arg23[%c3_91, %c0_92, %c0_93] : memref<4x8x8xf32, #tpu.memory_space<vmem>>, vector<1x8x8xf32>
    %160 = vector.shape_cast %159 : vector<1x8x8xf32> to vector<8x8xf32>
    %161 = vector.broadcast %146 : vector<8x1xf32> to vector<8x8xf32>
    %162 = arith.mulf %161, %160 : vector<8x8xf32>
    %163 = arith.truncf %149 : vector<8x8xf32> to vector<8x8xbf16>
    %164 = vector.extract_strided_slice %13 {offsets = [0, 24], sizes = [8, 8], strides = [1, 1]} : vector<8x32xbf16> to vector<8x8xbf16>
    %cst_94 = arith.constant dense<0.000000e+00> : vector<8x8xf32>
    %165 = tpu.matmul %163, %164, %cst_94 {dimension_numbers = #tpu.dot_dimension_numbers<[1], [0], [0], [1], [0, 0, 1, 1], [], []>} : vector<8x8xbf16>, vector<8x8xbf16>, vector<8x8xf32> -> vector<8x8xf32>
    %166 = arith.addf %162, %165 : vector<8x8xf32>
    %c3_95 = arith.constant 3 : index
    %c0_96 = arith.constant 0 : index
    %c0_97 = arith.constant 0 : index
    %167 = vector.load %arg23[%c3_95, %c0_96, %c0_97] : memref<4x8x8xf32, #tpu.memory_space<vmem>>, vector<1x8x8xf32>
    %168 = vector.shape_cast %167 : vector<1x8x8xf32> to vector<8x8xf32>
    %169 = vector.shape_cast %166 : vector<8x8xf32> to vector<1x8x8xf32>
    tpu.vector_store %arg23[%c3_95, %c0_96, %c0_97], %169 {strides = array<i32>} : memref<4x8x8xf32, #tpu.memory_space<vmem>>, vector<1x8x8xf32>,
    %c3_98 = arith.constant 3 : index
    %c0_99 = arith.constant 0 : index
    %c0_100 = arith.constant 0 : index
    %170 = vector.load %arg21[%c3_98, %c0_99, %c0_100] : memref<4x8x1xf32, #tpu.memory_space<vmem>>, vector<1x8x1xf32>
    %171 = vector.shape_cast %170 : vector<1x8x1xf32> to vector<8x1xf32>
    %172 = vector.shape_cast %144 : vector<8x1xf32> to vector<1x8x1xf32>
    tpu.vector_store %arg21[%c3_98, %c0_99, %c0_100], %172 {strides = array<i32>} : memref<4x8x1xf32, #tpu.memory_space<vmem>>, vector<1x8x1xf32>,
    %c0_i32_101 = arith.constant 0 : i32
    %173 = arith.cmpi eq, %arg2, %c0_i32_101 : i32
    %174 = arith.extui %173 : i1 to i32
    %c0_i32_102 = arith.constant 0 : i32
    %175 = arith.cmpi ne, %174, %c0_i32_102 : i32
    scf.if %175 {
      %c0_103 = arith.constant 0 : index
      %c0_104 = arith.constant 0 : index
      %c0_105 = arith.constant 0 : index
      %176 = vector.load %arg3[%c0_103, %c0_104, %c0_105] : memref<1x8x32xf32, #tpu.memory_space<vmem>>, vector<1x8x32xf32>
      %177 = vector.shape_cast %176 : vector<1x8x32xf32> to vector<8x32xf32>
      %c0_106 = arith.constant 0 : index
      %c0_107 = arith.constant 0 : index
      %178 = vector.load %arg16[%c0_106, %c0_107] : memref<1x32xf32, #tpu.memory_space<vmem>>, vector<1x32xf32>
      %179 = vector.broadcast %178 : vector<1x32xf32> to vector<8x32xf32>
      %180 = arith.addf %177, %179 : vector<8x32xf32>
      %c0_108 = arith.constant 0 : index
      %c0_109 = arith.constant 0 : index
      %c0_110 = arith.constant 0 : index
      %181 = vector.load %arg23[%c0_108, %c0_109, %c0_110] : memref<4x8x8xf32, #tpu.memory_space<vmem>>, vector<1x8x8xf32>
      %182 = vector.shape_cast %181 : vector<1x8x8xf32> to vector<8x8xf32>
      %c0_111 = arith.constant 0 : index
      %c0_112 = arith.constant 0 : index
      %c0_113 = arith.constant 0 : index
      %183 = vector.load %arg22[%c0_111, %c0_112, %c0_113] : memref<4x8x1xf32, #tpu.memory_space<vmem>>, vector<1x8x1xf32>
      %184 = vector.shape_cast %183 : vector<1x8x1xf32> to vector<8x1xf32>
      %185 = vector.broadcast %184 : vector<8x1xf32> to vector<8x8xf32>
      %186 = arith.divf %182, %185 : vector<8x8xf32>
      %187 = arith.truncf %186 : vector<8x8xf32> to vector<8x8xbf16>
      %c0_114 = arith.constant 0 : index
      %c0_115 = arith.constant 0 : index
      %c0_116 = arith.constant 0 : index
      %188 = vector.load %arg15[%c0_114, %c0_115, %c0_116] : memref<4x8x32xbf16, #tpu.memory_space<vmem>>, vector<1x8x32xbf16>
      %189 = vector.shape_cast %188 : vector<1x8x32xbf16> to vector<8x32xbf16>
      %cst_117 = arith.constant dense<0.000000e+00> : vector<8x32xf32>
      %190 = tpu.matmul %187, %189, %cst_117 {dimension_numbers = #tpu.dot_dimension_numbers<[1], [0], [0], [1], [0, 0, 1, 1], [], []>} : vector<8x8xbf16>, vector<8x32xbf16>, vector<8x32xf32> -> vector<8x32xf32>
      %191 = arith.addf %180, %190 : vector<8x32xf32>
      %c1_118 = arith.constant 1 : index
      %c0_119 = arith.constant 0 : index
      %c0_120 = arith.constant 0 : index
      %192 = vector.load %arg23[%c1_118, %c0_119, %c0_120] : memref<4x8x8xf32, #tpu.memory_space<vmem>>, vector<1x8x8xf32>
      %193 = vector.shape_cast %192 : vector<1x8x8xf32> to vector<8x8xf32>
      %c1_121 = arith.constant 1 : index
      %c0_122 = arith.constant 0 : index
      %c0_123 = arith.constant 0 : index
      %194 = vector.load %arg22[%c1_121, %c0_122, %c0_123] : memref<4x8x1xf32, #tpu.memory_space<vmem>>, vector<1x8x1xf32>
      %195 = vector.shape_cast %194 : vector<1x8x1xf32> to vector<8x1xf32>
      %196 = vector.broadcast %195 : vector<8x1xf32> to vector<8x8xf32>
      %197 = arith.divf %193, %196 : vector<8x8xf32>
      %198 = arith.truncf %197 : vector<8x8xf32> to vector<8x8xbf16>
      %c1_124 = arith.constant 1 : index
      %c0_125 = arith.constant 0 : index
      %c0_126 = arith.constant 0 : index
      %199 = vector.load %arg15[%c1_124, %c0_125, %c0_126] : memref<4x8x32xbf16, #tpu.memory_space<vmem>>, vector<1x8x32xbf16>
      %200 = vector.shape_cast %199 : vector<1x8x32xbf16> to vector<8x32xbf16>
      %cst_127 = arith.constant dense<0.000000e+00> : vector<8x32xf32>
      %201 = tpu.matmul %198, %200, %cst_127 {dimension_numbers = #tpu.dot_dimension_numbers<[1], [0], [0], [1], [0, 0, 1, 1], [], []>} : vector<8x8xbf16>, vector<8x32xbf16>, vector<8x32xf32> -> vector<8x32xf32>
      %202 = arith.addf %191, %201 : vector<8x32xf32>
      %c2_128 = arith.constant 2 : index
      %c0_129 = arith.constant 0 : index
      %c0_130 = arith.constant 0 : index
      %203 = vector.load %arg23[%c2_128, %c0_129, %c0_130] : memref<4x8x8xf32, #tpu.memory_space<vmem>>, vector<1x8x8xf32>
      %204 = vector.shape_cast %203 : vector<1x8x8xf32> to vector<8x8xf32>
      %c2_131 = arith.constant 2 : index
      %c0_132 = arith.constant 0 : index
      %c0_133 = arith.constant 0 : index
      %205 = vector.load %arg22[%c2_131, %c0_132, %c0_133] : memref<4x8x1xf32, #tpu.memory_space<vmem>>, vector<1x8x1xf32>
      %206 = vector.shape_cast %205 : vector<1x8x1xf32> to vector<8x1xf32>
      %207 = vector.broadcast %206 : vector<8x1xf32> to vector<8x8xf32>
      %208 = arith.divf %204, %207 : vector<8x8xf32>
      %209 = arith.truncf %208 : vector<8x8xf32> to vector<8x8xbf16>
      %c2_134 = arith.constant 2 : index
      %c0_135 = arith.constant 0 : index
      %c0_136 = arith.constant 0 : index
      %210 = vector.load %arg15[%c2_134, %c0_135, %c0_136] : memref<4x8x32xbf16, #tpu.memory_space<vmem>>, vector<1x8x32xbf16>
      %211 = vector.shape_cast %210 : vector<1x8x32xbf16> to vector<8x32xbf16>
      %cst_137 = arith.constant dense<0.000000e+00> : vector<8x32xf32>
      %212 = tpu.matmul %209, %211, %cst_137 {dimension_numbers = #tpu.dot_dimension_numbers<[1], [0], [0], [1], [0, 0, 1, 1], [], []>} : vector<8x8xbf16>, vector<8x32xbf16>, vector<8x32xf32> -> vector<8x32xf32>
      %213 = arith.addf %202, %212 : vector<8x32xf32>
      %c3_138 = arith.constant 3 : index
      %c0_139 = arith.constant 0 : index
      %c0_140 = arith.constant 0 : index
      %214 = vector.load %arg23[%c3_138, %c0_139, %c0_140] : memref<4x8x8xf32, #tpu.memory_space<vmem>>, vector<1x8x8xf32>
      %215 = vector.shape_cast %214 : vector<1x8x8xf32> to vector<8x8xf32>
      %c3_141 = arith.constant 3 : index
      %c0_142 = arith.constant 0 : index
      %c0_143 = arith.constant 0 : index
      %216 = vector.load %arg22[%c3_141, %c0_142, %c0_143] : memref<4x8x1xf32, #tpu.memory_space<vmem>>, vector<1x8x1xf32>
      %217 = vector.shape_cast %216 : vector<1x8x1xf32> to vector<8x1xf32>
      %218 = vector.broadcast %217 : vector<8x1xf32> to vector<8x8xf32>
      %219 = arith.divf %215, %218 : vector<8x8xf32>
      %220 = arith.truncf %219 : vector<8x8xf32> to vector<8x8xbf16>
      %c3_144 = arith.constant 3 : index
      %c0_145 = arith.constant 0 : index
      %c0_146 = arith.constant 0 : index
      %221 = vector.load %arg15[%c3_144, %c0_145, %c0_146] : memref<4x8x32xbf16, #tpu.memory_space<vmem>>, vector<1x8x32xbf16>
      %222 = vector.shape_cast %221 : vector<1x8x32xbf16> to vector<8x32xbf16>
      %cst_147 = arith.constant dense<0.000000e+00> : vector<8x32xf32>
      %223 = tpu.matmul %220, %222, %cst_147 {dimension_numbers = #tpu.dot_dimension_numbers<[1], [0], [0], [1], [0, 0, 1, 1], [], []>} : vector<8x8xbf16>, vector<8x32xbf16>, vector<8x32xf32> -> vector<8x32xf32>
      %224 = arith.addf %213, %223 : vector<8x32xf32>
      %c0_148 = arith.constant 0 : index
      %c0_149 = arith.constant 0 : index
      %c0_150 = arith.constant 0 : index
      %225 = vector.load %arg17[%c0_148, %c0_149, %c0_150] : memref<1x8x32xf32, #tpu.memory_space<vmem>>, vector<1x8x32xf32>
      %226 = vector.shape_cast %225 : vector<1x8x32xf32> to vector<8x32xf32>
      %227 = vector.shape_cast %224 : vector<8x32xf32> to vector<1x8x32xf32>
      tpu.vector_store %arg17[%c0_148, %c0_149, %c0_150], %227 {strides = array<i32>} : memref<1x8x32xf32, #tpu.memory_space<vmem>>, vector<1x8x32xf32>,
    } else {
    }
    return
  }
  func.func @transform_0(%arg0: i32, %arg1: i32, %arg2: i32) -> (i32, i32, i32) {
    %c0_i32 = arith.constant 0 : i32
    %c0_i32_0 = arith.constant 0 : i32
    return %arg0, %arg1, %c0_i32 : i32, i32, i32
  }
  func.func @transform_1(%arg0: i32, %arg1: i32, %arg2: i32) -> (i32, i32, i32) {
    %c0_i32 = arith.constant 0 : i32
    %0 = arith.cmpi eq, %arg1, %c0_i32 : i32
    %c0_i32_0 = arith.constant 0 : i32
    %1 = arith.select %0, %arg2, %c0_i32_0 : i32
    %c0_i32_1 = arith.constant 0 : i32
    %c0_i32_2 = arith.constant 0 : i32
    return %arg0, %1, %c0_i32_1 : i32, i32, i32
  }
  func.func @transform_2(%arg0: i32, %arg1: i32, %arg2: i32) -> (i32, i32, i32) {
    %c0_i32 = arith.constant 0 : i32
    return %arg0, %arg1, %arg2 : i32, i32, i32
  }
  func.func @transform_3(%arg0: i32, %arg1: i32, %arg2: i32) -> (i32, i32) {
    %c0_i32 = arith.constant 0 : i32
    %c0_i32_0 = arith.constant 0 : i32
    %c0_i32_1 = arith.constant 0 : i32
    return %c0_i32, %c0_i32_0 : i32, i32
  }
  func.func @transform_4(%arg0: i32, %arg1: i32, %arg2: i32) -> (i32, i32) {
    %c0_i32 = arith.constant 0 : i32
    %c0_i32_0 = arith.constant 0 : i32
    return %arg1, %c0_i32 : i32, i32
  }
  func.func @transform_5(%arg0: i32, %arg1: i32, %arg2: i32) -> (i32, i32) {
    %c0_i32 = arith.constant 0 : i32
    %c0_i32_0 = arith.constant 0 : i32
    return %arg1, %c0_i32 : i32, i32
  }
  func.func @transform_6(%arg0: i32, %arg1: i32, %arg2: i32) -> (i32, i32) {
    %c0_i32 = arith.constant 0 : i32
    %0 = arith.cmpi eq, %arg1, %c0_i32 : i32
    %c0_i32_0 = arith.constant 0 : i32
    %1 = arith.select %0, %arg2, %c0_i32_0 : i32
    %c0_i32_1 = arith.constant 0 : i32
    %c0_i32_2 = arith.constant 0 : i32
    return %1, %c0_i32_1 : i32, i32
  }
  func.func @transform_7(%arg0: i32, %arg1: i32, %arg2: i32) -> (i32, i32) {
    %c0_i32 = arith.constant 0 : i32
    %0 = arith.cmpi eq, %arg1, %c0_i32 : i32
    %c0_i32_0 = arith.constant 0 : i32
    %1 = arith.select %0, %arg2, %c0_i32_0 : i32
    %c0_i32_1 = arith.constant 0 : i32
    %c0_i32_2 = arith.constant 0 : i32
    return %1, %c0_i32_1 : i32, i32
  }
  func.func @transform_8(%arg0: i32, %arg1: i32, %arg2: i32) -> (i32, i32) {
    %c0_i32 = arith.constant 0 : i32
    %c0_i32_0 = arith.constant 0 : i32
    %c0_i32_1 = arith.constant 0 : i32
    return %c0_i32, %c0_i32_0 : i32, i32
  }
  func.func @transform_9(%arg0: i32, %arg1: i32, %arg2: i32) -> (i32, i32) {
    %c0_i32 = arith.constant 0 : i32
    %c0_i32_0 = arith.constant 0 : i32
    %c0_i32_1 = arith.constant 0 : i32
    return %c0_i32, %c0_i32_0 : i32, i32
  }
  func.func @transform_10(%arg0: i32, %arg1: i32, %arg2: i32) -> (i32, i32) {
    %c0_i32 = arith.constant 0 : i32
    %c0_i32_0 = arith.constant 0 : i32
    %c0_i32_1 = arith.constant 0 : i32
    return %c0_i32, %c0_i32_0 : i32, i32
  }
  func.func @transform_11(%arg0: i32, %arg1: i32, %arg2: i32) -> (i32, i32) {
    %c0_i32 = arith.constant 0 : i32
    %c0_i32_0 = arith.constant 0 : i32
    %c0_i32_1 = arith.constant 0 : i32
    return %c0_i32, %c0_i32_0 : i32, i32
  }
  func.func @transform_12(%arg0: i32, %arg1: i32, %arg2: i32) -> (i32, i32, i32) {
    %c0_i32 = arith.constant 0 : i32
    %c0_i32_0 = arith.constant 0 : i32
    %c0_i32_1 = arith.constant 0 : i32
    %c0_i32_2 = arith.constant 0 : i32
    return %c0_i32, %c0_i32_0, %c0_i32_1 : i32, i32, i32
  }
  func.func @transform_13(%arg0: i32, %arg1: i32, %arg2: i32) -> (i32, i32) {
    %c0_i32 = arith.constant 0 : i32
    %c0_i32_0 = arith.constant 0 : i32
    %c0_i32_1 = arith.constant 0 : i32
    return %c0_i32, %c0_i32_0 : i32, i32
  }
  func.func @transform_14(%arg0: i32, %arg1: i32, %arg2: i32) -> (i32, i32, i32) {
    %c0_i32 = arith.constant 0 : i32
    %c0_i32_0 = arith.constant 0 : i32
    return %arg0, %arg1, %c0_i32 : i32, i32, i32
  }
}

</mosaic_0001>

<bundles_post_ra>
// kernel: tpu_custom_call.1
= control target key start
LH: loop header
LB: loop body
LE: loop exit
PB: predicated region body
PF: predicated region fallthrough
CT: control target
= control target key end

     0   :  { %s3280_s0 = inlined_call_operand.hbm [shape: f32[2,8,32], index: 0, kind: input, shape index: {}]   ;;  %s3281_s1 = inlined_call_operand.hbm [shape: f32[2,8,32], index: 1, kind: input, shape index: {}]   ;;  %s3282_s2 = inlined_call_operand.hbm [shape: bf16[2,8,8], index: 2, kind: input, shape index: {}]   ;;  %s3283_s3 = inlined_call_operand.vmem [shape: f32[1,32], index: 3, kind: input, shape index: {}]   ;;  %s3284_s4 = inlined_call_operand.hbm [shape: f32[8,32], index: 4, kind: input, shape index: {}]   ;;  %s3285_s5 = inlined_call_operand.hbm [shape: f32[8,32], index: 5, kind: input, shape index: {}]   ;;  %s3286_s6 = inlined_call_operand.hbm [shape: f32[8,32], index: 6, kind: input, shape index: {}]   ;;  %s3287_s7 = inlined_call_operand.hbm [shape: f32[8,32], index: 7, kind: input, shape index: {}]   ;;  %s3288_s8 = inlined_call_operand.hbm [shape: bf16[32,64], index: 8, kind: input, shape index: {}]   ;;  %s3289_s9 = inlined_call_operand.vmem [shape: f32[1,64], index: 9, kind: input, shape index: {}]   ;;  %s3290_s10 = inlined_call_operand.vmem [shape: bf16[32,96], index: 10, kind: input, shape index: {}]   ;;  %s3291_s11 = inlined_call_operand.vmem [shape: f32[1,96], index: 11, kind: input, shape index: {}]   ;;  %s3292_s12 = inlined_call_operand.hbm [shape: bf16[4,8,32], index: 12, kind: input, shape index: {}]   ;;  %s3293_s13 = inlined_call_operand.vmem [shape: f32[1,32], index: 13, kind: input, shape index: {}]   ;;  %s3294_s14 = inlined_call_operand.hbm [shape: f32[2,8,32], index: 14, kind: output, shape index: {}]  }
   0x1   :  { %3315 = sst [smem:[#allocation38_spill]] %s3284_s4 }
   0x2   :  { %3316 = sst [smem:[#allocation39_spill]] %s3286_s6 }
   0x3   :  { %3317 = sst [smem:[#allocation40_spill]] %s3288_s8 }
   0x4   :  { %3318 = sst [smem:[#allocation41_spill]] %s3289_s9 }
   0x5   :  { %3319 = sst [smem:[#allocation42_spill]] %s3291_s11 }
   0x6   :  { %3320 = sst [smem:[#allocation43_spill]] %s3293_s13 }
   0x7   :  { %3321 = sst [smem:[#allocation44_spill]] %s3294_s14 }
   0x8   :  { %19 = vsyncpa [#allocation9], 0 }
   0x9   :  { %21 = vsyncpa [#allocation9 + $0x1], 0 }
   0xa   :  { %22 = vsyncpa [#allocation12], 0 }
   0xb   :  { %24 = vsyncpa [#allocation12 + $0x1], 0 }
   0xc   :  { %25 = vsyncpa [#allocation15], 0 }
   0xd   :  { %26 = vsyncpa [#allocation18], 0 }
   0xe   :  { %27 = vsyncpa [#allocation21], 0 }
   0xf   :  { %28 = vsyncpa [#allocation10], 0 }
  0x10   :  { %30 = vsyncpa [#allocation10 + $0x1], 0  ;;  %s2774_s29 = smov 0   ;;  %s2776_s30 = smov 0  }
  0x11   :  { %s2778_s15 = smov 0   ;;  %s2780_s16 = smov 0  }
  0x12   :  { %s2782_s17 = smov 0   ;;  %s2784_s18 = smov 0  }
  0x13 LB: > { %3322 = sst [smem:[#allocation30_spill]] %s2655_s29  ;;  %s2805_s19 = sadd.s32 4294967295, %s2675_s18   ;;  %s2675_s18 = sphi %s2784_s18, %s36_s18   ;;  %s2671_s17 = sphi %s2782_s17, %s3374_s17   ;;  %s2667_s16 = sphi %s2780_s16, %s3373_s16   ;;  %s2663_s15 = sphi %s2778_s15, %s3369_s15   ;;  %s2659_s30 = sphi %s2776_s30, %s3372_s30   ;;  %s2655_s29 = sphi %s2774_s29, %s3371_s29  }
  0x14   : > { %3323 = sst [smem:[#allocation31_spill]] %s2663_s15  ;;  %p1984_p0 = scmp.ge.s32.totalorder %s2675_s18, 1 }
  0x15   : > { %3324 = sst [smem:[#allocation32_spill]] %s2667_s16  ;;  %p3296_p1 = scmp.eq.s32.totalorder %s2805_s19, 0 }
  0x16   : > { %3325 = sst [smem:[#allocation33_spill]] %s2675_s18  ;;  %p437_p2 = scmp.lt.s32.totalorder %s2675_s18, 3 }
  0x17   : > { %s2677_s21 = smov [#allocation14]   ;;  %s2678_s23 = smov [#allocation17]  }
  0x18   : > { %p2810_p3 = pnand %p1984_p0, %p437_p2  ;;  %s455_s22 = sshll.u32 %s2677_s21, 4  ;;  %s456_s22 = int_to_ptr.vmem [resolvable:$true] %s455_s22 }
  0x19   : > { %s483_s24 = sshll.u32 %s2678_s23, 4  ;;  %s2679_s26 = smov [#allocation20]   ;;  %s484_s24 = int_to_ptr.vmem [resolvable:$true] %s483_s24 }
  0x1a   : > { %s3326_s20 = scalar_select %p2810_p3, 1, 0 }
  0x1b   : > { %p2190_p5 = pneg %p2810_p3  ;;  %s508_s27 = sshll.u32 %s2679_s26, 4  ;;  %s2823_s27 = int_to_ptr.vmem [resolvable:$true] %s508_s27 }
  0x1c   : > { %s2350_s21 = scalar_lea.vmem %s456_s22, 128  ;;  %p2358_p11 = scmp.lt.s32.totalorder %s456_s22, %s456_s22 }
  0x1d   : > { %p2819_p6 = pnand %p2190_p5, %p3296_p1  ;;  %p2351_p8 = scmp.ne.s32.totalorder %s456_s22, %s2350_s21 }
  0x1e   : > { %p2359_p12 = scmp.lt.s32.totalorder %s2350_s21, %s2350_s21 }
  0x1f   : > { %s3327_s25 = scalar_select %p2819_p6, 1, 0 }
  0x20   : > { %p2827_p7 = pneg %p2819_p6  ;;  %p2360_p13 = por %p2359_p12, %p2358_p11 }
  0x22   : > { %p2353_p9 = pnand %p2351_p8, %p2827_p7 }
  0x24   : > { %p2354_p10 = pneg %p2353_p9 }
  0x26   : > { %p2361_p0 = pnand %p2360_p13, %p2354_p10 }
  0x28   : > { %2364 = shalt.err (!%p2361_p0)
}
  0x29   : > { %s3329_s4 = sld [smem:[#allocation38_spill]]  ;;  %s2376_s14 = scalar_lea.vmem %s484_s24, 128 }
  0x2a   : > { %p2377_p2 = scmp.ne.s32.totalorder %s484_s24, %s2376_s14  ;;  %p2384_p1 = scmp.lt.s32.totalorder %s484_s24, %s484_s24 }
  0x2b   : > { %p2385_p8 = scmp.lt.s32.totalorder %s2376_s14, %s2376_s14 }
  0x2c   : > { %p2379_p5 = pnand %p2377_p2, %p2827_p7 }
  0x2d   : > { %p2386_p9 = por %p2385_p8, %p2384_p1 }
  0x2e   : > { %p2380_p4 = pneg %p2379_p5 }
  0x2f   : > { %2193 = dma.hbm_to_vmem [thread:$0]  (!%p2819_p6), %s3329_s4, 128, %s456_s22, [#allocation15]  }
  0x30   : > { %p2387_p3 = pnand %p2386_p9, %p2380_p4 }
  0x32   : > { %2390 = shalt.err (!%p2387_p3)
}
  0x33   : > { %s3330_s6 = sld [smem:[#allocation39_spill]]  ;;  %s2402_s22 = scalar_lea.vmem %s2823_s27, 256 }
  0x34   : > { %p2403_p10 = scmp.ne.s32.totalorder %s2823_s27, %s2402_s22  ;;  %p2410_p13 = scmp.lt.s32.totalorder %s2823_s27, %s2823_s27 }
  0x35   : > { %p2411_p1 = scmp.lt.s32.totalorder %s2402_s22, %s2402_s22 }
  0x36   : > { %p2405_p11 = pnand %p2403_p10, %p2827_p7 }
  0x37   : > { %p2412_p4 = por %p2411_p1, %p2410_p13 }
  0x38   : > { %p2406_p12 = pneg %p2405_p11 }
  0x39   : > { %2199 = dma.hbm_to_vmem [thread:$0]  (!%p2819_p6), %s3330_s6, 128, %s484_s24, [#allocation18]  }
  0x3a   : > { %p2413_p3 = pnand %p2412_p4, %p2406_p12 }
  0x3c   : > { %2416 = shalt.err (!%p2413_p3)
}
  0x3d   : > { %s3298_s14 = smov 64   ;;  %s3299_s13 = smov 4  }
  0x3e   : > { %s3331_s8 = sld [smem:[#allocation40_spill]]  ;;  %s1983_s26 = sadd.s32 4294967294, %s2675_s18  }
  0x3f   : > { %s55_s21 = sadd.s32 1, %s2671_s17  ;;  %s64_s22 = sadd.s32 1, %s2663_s15 }
  0x40   : > { %p57_p0 = scmp.ge.s32.totalorder %s55_s21, 2  ;;  %p71_p2 = scmp.ne.s32.totalorder %s2663_s15, %s2659_s30 }
  0x41   : > { %p72_p5 = scmp.eq.s32.totalorder %s2675_s18, 0  ;;  %p77_p8 = scmp.ne.s32.totalorder %s2659_s30, %s2655_s29 }
  0x42   : > { %s3376_s21 = smov (%p57_p0, %s55_s21), 0  ;;  %p3334_p10 = scmp.eq.s32.totalorder %s2805_s19, 0 }
  0x43   : > { %3332 = sst [smem:[#allocation34_spill]] %s3376_s21  ;;  %p2870_p9 = por %p72_p5, %p71_p2 }
  0x44   : > { %2205 = dma.hbm_to_vmem [thread:$0]  (!%p2819_p6), %s3331_s8, 256, %s2823_s27, [#allocation21], %s3298_s14, %s3298_s14, %s3299_s13  }
  0x45   : > { %p2876_p11 = por %p3334_p10, %p77_p8  ;;  %s59_s24 = ssub.s32 %s2671_s17, %s3376_s21 }
  0x46   : > { %p424_p12 = scmp.eq.s32.totalorder %s2805_s19, 1  ;;  %p62_p13 = scmp.eq.s32.totalorder %s59_s24, 0 }
  0x47   : > { %s3335_s27 = scalar_select %p2876_p11, 1, 0 }
  0x48   : > { %p430_p1 = scmp.eq.s32.totalorder %s1983_s26, 1  ;;  %p2883_p4 = por %p424_p12, %p71_p2 }
  0x49   : > { %p2229_p3 = scmp.lt.s32.totalorder %s2675_s18, 2  ;;  %s2896_s6 = sand.u32 1, %s2663_s15  }
  0x4a   : > { %s3336_s23 = scalar_select %p2883_p4, 1, 0 }
  0x4b   : > { %s2889_s14 = scalar_select %p62_p13, %s2663_s15, %s64_s22  }
  0x4c   : > { %3337 = sst [smem:[#allocation35_spill]] %s3336_s23  ;;  %p2891_p0 = por %p430_p1, %p77_p8 }
  0x4d   : > { %3338 = sst [smem:[#allocation36_spill]] %s2889_s14  ;;  %s1992_s8 = sshll.u32 %s2896_s6, 3 }
  0x4e   : > { %s3339_s13 = scalar_select %p2891_p0, 1, 0 }
  0x4f   : > { %s1993_s21 = sshll.u32 %s2671_s17, 7  ;;  %p2902_p5 = pnand %p2229_p3, %p2870_p9 }
  0x50   : > { %3340 = sst [smem:[#allocation37_spill]] %s3339_s13  ;;  %s566_s24 = sand.u32 1, %s2675_s18  }
  0x51   : > { %s3341_s26 = scalar_select %p2902_p5, 1, 0 }
  0x52   : > { %s578_s29 = scalar_lea.hbm %s3281_s1, %s1993_s21  ;;  %s570_s15 = scalar_lea.vmem [#allocation11], %s1992_s8 }
  0x53   : > { %s580_s13 = sshll.u32 %s570_s15, 4  ;;  %s2682_s23 = smov [#allocation16]   ;;  %s581_s13 = int_to_ptr.vmem [resolvable:$true] %s580_s13 }
  0x54   : > { %s468_s16 = sshll.u32 %s2682_s23, 4  ;;  %s2914_s9 = scalar_lea.sflag [#allocation12], %s566_s24  ;;  %s469_s16 = int_to_ptr.vmem [resolvable:$true] %s468_s16 }
  0x55   : > { %p3308_p2 = pneg %p2902_p5  ;;  %s2430_s4 = scalar_lea.vmem %s581_s13, 128 }
  0x56   : > { %p2431_p8 = scmp.ne.s32.totalorder %s581_s13, %s2430_s4  ;;  %s2683_s18 = smov [#allocation11]  }
  0x57   : > { %s2435_s11 = sshll.u32 %s2683_s18, 4  ;;  %s2436_s11 = int_to_ptr.vmem [resolvable:$false] %s2435_s11 }
  0x58   : > { %p2433_p9 = pnand %p2431_p8, %p3308_p2  ;;  %s2437_s14 = scalar_lea.vmem %s2436_s11, 256 }
  0x59   : > { %p2438_p12 = scmp.lt.s32.totalorder %s581_s13, %s2436_s11  ;;  %p2439_p13 = scmp.lt.s32.totalorder %s2437_s14, %s2430_s4 }
  0x5a   : > { %p2434_p10 = pneg %p2433_p9 }
  0x5b   : > { %p2440_p1 = por %p2439_p13, %p2438_p12 }
  0x5d   : > { %p2441_p3 = pnand %p2440_p1, %p2434_p10 }
  0x5f   : > { %2444 = shalt.err (!%p2441_p3)
}
  0x60   : > { %2215 = dma.hbm_to_vmem [thread:$0]  (!%p2902_p5), %s578_s29, 128, %s581_s13, %s2914_s9  }
  0x61   : > { %s2456_s15 = scalar_lea.vmem %s469_s16, 128  ;;  %p2464_p2 = scmp.lt.s32.totalorder %s469_s16, %s469_s16 }
  0x62   : > { %p2457_p0 = scmp.ne.s32.totalorder %s469_s16, %s2456_s15  ;;  %p2465_p4 = scmp.lt.s32.totalorder %s2456_s15, %s2456_s15 }
  0x64   : > { %p2459_p8 = pnand %p2457_p0, %p2827_p7  ;;  %p2466_p11 = por %p2465_p4, %p2464_p2 }
  0x66   : > { %p2460_p9 = pneg %p2459_p8 }
  0x68   : > { %p2467_p6 = pnand %p2466_p11, %p2460_p9 }
  0x6a   : > { %2470 = shalt.err (!%p2467_p6)
}
  0x6b   : > { %p3342_p12 = scmp.ne.s32.totalorder %s3327_s25, 0  ;;  %s2684_s23 = smov [#allocation19]  }
  0x6c   : > { %s498_s29 = sshll.u32 %s2684_s23, 4  ;;  %s2685_s13 = smov [#allocation22]   ;;  %s499_s29 = int_to_ptr.vmem [resolvable:$true] %s498_s29 }
  0x6d   : > { %2196 = dma.hbm_to_vmem [thread:$0]  (!%p3342_p12), %s3285_s5, 128, %s469_s16, [#allocation15]  }
  0x6e   : > { %s530_s24 = sshll.u32 %s2685_s13, 4  ;;  %s2482_s22 = scalar_lea.vmem %s499_s29, 128  ;;  %s531_s24 = int_to_ptr.vmem [resolvable:$true] %s530_s24 }
  0x6f   : > { %p2483_p0 = scmp.ne.s32.totalorder %s499_s29, %s2482_s22  ;;  %p2490_p4 = scmp.lt.s32.totalorder %s499_s29, %s499_s29 }
  0x70   : > { %p2491_p11 = scmp.lt.s32.totalorder %s2482_s22, %s2482_s22 }
  0x71   : > { %p2485_p10 = pnand %p2483_p0, %p2827_p7 }
  0x72   : > { %p2492_p6 = por %p2491_p11, %p2490_p4 }
  0x73   : > { %p2486_p13 = pneg %p2485_p10 }
  0x75   : > { %p2493_p2 = pnand %p2492_p6, %p2486_p13 }
  0x77   : > { %2496 = shalt.err (!%p2493_p2)
}
  0x78   : > { %2202 = dma.hbm_to_vmem [thread:$0]  (!%p3342_p12), %s3287_s7, 128, %s499_s29, [#allocation18]  }
  0x79   : > { %s2508_s16 = scalar_lea.vmem %s531_s24, 256  ;;  %p2516_p9 = scmp.lt.s32.totalorder %s531_s24, %s531_s24 }
  0x7a   : > { %p2509_p1 = scmp.ne.s32.totalorder %s531_s24, %s2508_s16  ;;  %p2517_p0 = scmp.lt.s32.totalorder %s2508_s16, %s2508_s16 }
  0x7c   : > { %p2511_p3 = pnand %p2509_p1, %p2827_p7  ;;  %p2518_p10 = por %p2517_p0, %p2516_p9 }
  0x7e   : > { %p2512_p8 = pneg %p2511_p3 }
  0x80   : > { %p2519_p5 = pnand %p2518_p10, %p2512_p8 }
  0x82   : > { %2522 = shalt.err (!%p2519_p5)
}
  0x83   : > { %s3343_s15 = smov 4   ;;  %s3344_s11 = smov 64  }
  0x84   : > { %2208 = dma.hbm_to_vmem [thread:$0]  (!%p3342_p12), %s3292_s12, 256, %s531_s24, [#allocation21], %s3344_s11, %s3344_s11, %s3343_s15  }
  0x85   : > { %s557_s13 = scalar_lea.hbm %s3280_s0, %s1993_s21  ;;  %s551_s22 = scalar_lea.vmem [#allocation8], %s1992_s8 }
  0x86   : > { %s559_s25 = sshll.u32 %s551_s22, 4  ;;  %s1996_s4 = sshll.u32 %s2896_s6, 2  ;;  %s560_s25 = int_to_ptr.vmem [resolvable:$true] %s559_s25 }
  0x87   : > { %s548_s14 = scalar_lea.sflag [#allocation9], %s2896_s6  ;;  %s2536_s16 = scalar_lea.vmem %s560_s25, 128 }
  0x88   : > { %p2537_p7 = scmp.ne.s32.totalorder %s560_s25, %s2536_s16  ;;  %p3345_p5 = scmp.ne.s32.totalorder %s3341_s26, 0 }
  0x89   : > { %s2686_s18 = smov [#allocation8]  }
  0x8a   : > { %p3346_p13 = pneg %p3345_p5  ;;  %s2541_s23 = sshll.u32 %s2686_s18, 4  ;;  %s2542_s23 = int_to_ptr.vmem [resolvable:$false] %s2541_s23 }
  0x8b   : > { %s2543_s24 = scalar_lea.vmem %s2542_s23, 256  ;;  %p2544_p12 = scmp.lt.s32.totalorder %s560_s25, %s2542_s23 }
  0x8c   : > { %p2539_p4 = pnand %p2537_p7, %p3346_p13  ;;  %p2545_p6 = scmp.lt.s32.totalorder %s2543_s24, %s2536_s16 }
  0x8e   : > { %p2540_p11 = pneg %p2539_p4  ;;  %p2546_p2 = por %p2545_p6, %p2544_p12 }
  0x90   : > { %p2547_p1 = pnand %p2546_p2, %p2540_p11 }
  0x92   : > { %2550 = shalt.err (!%p2547_p1)
}
  0x93   : > { %2212 = dma.hbm_to_vmem [thread:$0]  (!%p3345_p5), %s557_s13, 128, %s560_s25, %s548_s14  }
  0x94   : > { %s1997_s6 = sshll.u32 %s2671_s17, 6  ;;  %s591_s8 = scalar_lea.vmem [#allocation13], %s1996_s4 }
  0x95   : > { %s600_s21 = sshll.u32 %s591_s8, 4  ;;  %s598_s28 = scalar_lea.hbm %s3282_s2, %s1997_s6  ;;  %s601_s21 = int_to_ptr.vmem [resolvable:$true] %s600_s21 }
  0x96   : > { %s2564_s29 = scalar_lea.vmem %s601_s21, 64  ;;  %p3347_p8 = pmov %p3346_p13 }
  0x97   : > { %p2565_p3 = scmp.ne.s32.totalorder %s601_s21, %s2564_s29  ;;  %s2687_s22 = smov [#allocation13]  }
  0x98   : > { %s2569_s16 = sshll.u32 %s2687_s22, 4  ;;  %s2570_s16 = int_to_ptr.vmem [resolvable:$false] %s2569_s16 }
  0x99   : > { %p2567_p9 = pnand %p2565_p3, %p3347_p8  ;;  %s2571_s18 = scalar_lea.vmem %s2570_s16, 128 }
  0x9a   : > { %p2572_p10 = scmp.lt.s32.totalorder %s601_s21, %s2570_s16  ;;  %p2573_p7 = scmp.lt.s32.totalorder %s2571_s18, %s2564_s29 }
  0x9b   : > { %p2568_p0 = pneg %p2567_p9 }
  0x9c   : > { %p2574_p13 = por %p2573_p7, %p2572_p10 }
  0x9e   : > { %p2575_p4 = pnand %p2574_p13, %p2568_p0 }
  0xa0   : > { %2578 = shalt.err (!%p2575_p4)
}
  0xa1   : > { %2218 = dma.hbm_to_vmem [thread:$0]  (!%p3345_p5), %s598_s28, 64, %s601_s21, %s2914_s9  }
  0xa2   : > { %p3348_p11 = scmp.ne.s32.totalorder %s3326_s20, 0 }
  0xa3   : > { %s2975_s13 = sand.u32 (!%p3348_p11), 1, %s2659_s30   ;;  %p3349_p12 = scmp.ne.s32.totalorder (!%p3348_p11), %s3335_s27, 0 }
  0xa4   : > { %609 = sbr.rel (%p3348_p11) target bundleno = 1796 (0x704), region = 76  ;;  %s2978_s25 = sshll.u32 (!%p3348_p11), %s2975_s13, 3 }
  0xa5   : > { %s612_s4 = scalar_lea.sflag (!%p3348_p11), [#allocation9], %s2975_s13  ;;  %s615_s14 = scalar_lea.vmem (!%p3348_p11), [#allocation8], %s2978_s25 }
  0xa9   : > { %2630 = dma.done.wait (%p3349_p12), %s612_s4, 128  }
  0xaa   : > { %2632 = vsyncadd (%p3349_p12), %s612_s4, 4294967168  ;;  %s620_s9 = sand.u32 1, %s2805_s19   ;;  %s624_s26 = scalar_lea.vmem [#allocation11], %s2978_s25 }
  0xab   : > { %s621_s20 = scalar_lea.sflag [#allocation12], %s620_s9 }
  0xac   : > { %2634 = dma.done.wait (%p3349_p12), %s621_s20, 192  }
  0xad   : > { %2636 = vsyncadd (%p3349_p12), %s621_s20, 4294967104  ;;  %s2001_s23 = sshll.u32 %s2975_s13, 2  ;;  %p3350_p5 = scmp.eq.s32.totalorder %s2805_s19, 0 }
  0xae   : > { %s2993_s24 = scalar_lea.vmem [#allocation13], %s2001_s23 }
  0xaf   : > { %2638 = dma.done.wait (%p3350_p5), [#allocation15], 256   ;;  %p3351_p6 = pmov %p3350_p5 }
  0xb0   : > { %p3352_p2 = pmov %p3350_p5 }
  0xb1   : > { %2640 = vsyncadd (%p3351_p6), [#allocation15], 4294967040 }
  0xb2   : > { %2642 = dma.done.wait (%p3352_p2), [#allocation18], 256   ;;  %p3353_p1 = pmov %p3352_p2 }
  0xb4   : > { %2644 = vsyncadd (%p3353_p1), [#allocation18], 4294967040  ;;  %p3354_p3 = pmov %p3353_p1 }
  0xb5   : > { %p3355_p8 = pmov %p3353_p1 }
  0xb6   : > { %2646 = dma.done.wait (%p3354_p3), [#allocation21], 512  }
  0xb7   : > { %2648 = vsyncadd (%p3355_p8), [#allocation21], 4294966784  ;;  %vm726_vm0 = vcmask 261120   ;;  %v843_v0 = vld [vmem:[%s624_s26] sm:$0xff]  ;;  %v3007_v1 = vld [vmem:[%s615_s14] sm:$0xff]  ;;  %v2688_v8 = vmov 0.0  }
  0xb8   : > { %v844_v2 = vmul.f32 %v843_v0, %v843_v0  ;;  %v725_v3 = vmul.f32 %v3007_v1, %v3007_v1  ;;  %v2305_v6 = vld [vmem:[%s3290_s10 + $0x8] sm:$0xff]   ;;  %v2306_v7 = vld [vmem:[#allocation20 + $0x8] sm:$0xff]   ;;  %2078 = vmatprep.subr.bf16.mxu1 %v2688_v8  ;;  %2070 = vmatprep.subr.bf16.mxu0 %v2688_v8  ;;  %vm2689_vm1 = vmmov 0   ;;  %v2308_v10 = vld [vmem:[#allocation20] sm:$0xff]   ;;  %s2690_s21 = smov 32   ;;  %s3356_s22 = sld [smem:[#allocation42_spill]] }
  0xb9   : > { %2079 = vmatpush3.bf16.msra.mxu1 %v2305_v6  ;;  %2071 = vmatpush3.bf16.msra.mxu0 %v2306_v7  ;;  %v2307_v9 = vld [vmem:[%s3290_s10] sm:$0xff]   ;;  %v930_v11 = vld [vmem:[#allocation19] sm:$0xff]  ;;  %vm834_vm2 = vcmask 64512   ;;  %s3357_s4 = sld [smem:[#allocation41_spill]]  ;;  %s2691_s14 = smov 96   ;;  %v809_v47 = vld [vmem:[#allocation14] sm:$0xff] }
  0xba   : > { %v846_v4 = vsel %vm726_vm0, %v844_v2, 0.0  ;;  %v727_v5 = vsel %vm726_vm0, %v725_v3, 0.0  ;;  %2080 = vmatprep.subr.bf16.mxu1 %v2688_v8  ;;  %2082 = vmatprep.mubr.msk.bf16.mxu1 %vm2689_vm1, %v2688_v8  ;;  %v811_v12 = vld [vmem:[#allocation16] sm:$0xff]  ;;  %835 = vst.msk [vmem:[#allocation7] sm:$0xff] %vm834_vm2, %v2688_v8  ;;  %836 = vst.msk [vmem:[#allocation7 + $0x8] sm:$0xff] %vm834_vm2, %v2688_v8  ;;  %v928_v44 = vld [vmem:[#allocation17] sm:$0xff] }
  0xbb   : > { %847 = vadd.xlane.f32.xlu0 %v846_v4  ;;  %2072 = vmatprep.subr.bf16.mxu0 %v2688_v8  ;;  %v2039_v20 = vld [vmem:[%s3283_s3] ss:$0 sm:$0xff]  ;;  %837 = vst.msk [vmem:[#allocation7 + $0x10] sm:$0xff] %vm834_vm2, %v2688_v8  ;;  %838 = vst.msk [vmem:[#allocation7 + $0x18] sm:$0xff] %vm834_vm2, %v2688_v8  ;;  %vm823_vm3 = vcmask 257024   ;;  %s2692_s9 = smov 120  }
  0xbc   : > { %2074 = vmatprep.mubr.msk.bf16.mxu0 %vm2689_vm1, %v2688_v8  ;;  %932 = vrot.lane.b32.xlu1 %v930_v11, %s2690_s21  ;;  %s2693_s20 = smov 104   ;;  %s2694_s26 = smov 112   ;;  %vm825_vm4 = vcmask 7168   ;;  %vm1049_vm5 = vcmask 1043456  }
  0xbd   : > { %2081 = vmatpush3.bf16.msra.mxu1 %v2307_v9  ;;  %2073 = vmatpush3.bf16.msra.mxu0 %v2308_v10  ;;  %830 = vst.msk [vmem:[#allocation6] sm:$0xff] %vm825_vm4, %v2688_v8  ;;  %831 = vst.msk [vmem:[#allocation6 + $0x8] sm:$0xff] %vm825_vm4, %v2688_v8  ;;  %s2697_s23 = smov 64   ;;  %s3359_s19 = sld [smem:[#allocation43_spill]] }
  0xbe   : > { %2092 = vmatprep.subr.bf16.mxu1 %v2688_v8  ;;  %2086 = vmatprep.subr.bf16.mxu0 %v2688_v8  ;;  %v2013_v29 = vld [vmem:[%s3356_s22] ss:$0 sm:$0xff]  ;;  %832 = vst.msk [vmem:[#allocation6 + $0x10] sm:$0xff] %vm825_vm4, %v2688_v8  ;;  %833 = vst.msk [vmem:[#allocation6 + $0x18] sm:$0xff] %vm825_vm4, %v2688_v8  ;;  %s3360_s8 = sld [smem:[#allocation35_spill]]  ;;  %s711_s15 = scalar_lea.vmem [#allocation23], %s2978_s25 }
  0xbf   : > { %728 = vadd.xlane.f32.xlu0 %v727_v5  ;;  %v2009_v33 = vld [vmem:[%s3357_s4] ss:$0 sm:$0xff]  ;;  %v963_v5 = vld [vmem:[%s2993_s24] sm:$0xf]  ;;  %s3358_s24 = sld [smem:[#allocation32_spill]]  ;;  %s1780_s11 = sshll.u32 %s711_s15, 4  ;;  %s3233_s11 = int_to_ptr.vmem [resolvable:$true] %s1780_s11 }
  0xc0   : > { %813 = vrot.lane.b32.xlu1 %v811_v12, %s2690_s21  ;;  %v964_v6 = vunpack.c.l.bf16 %v963_v5  ;;  %s3361_s22 = sld [smem:[#allocation44_spill]]  ;;  %s1766_s18 = scalar_lea.sflag [#allocation10], %s2975_s13 }
  0xc1   : > { %s2579_s25 = scalar_lea.vmem %s3233_s11, 128  ;;  %s2698_s4 = smov [#allocation23]  }
  0xc2   : > { %p2580_p9 = scmp.ne.s32.totalorder %s3233_s11, %s2579_s25 }
  0xc4   : > { %p3362_p0 = scmp.ne.s32.totalorder %s3360_s8, 0 }
  0xc5   : > { %s2035_s21 = sshll.u32 %s3358_s24, 7 }
  0xc6   : > { %s3231_s16 = scalar_lea.hbm %s3361_s22, %s2035_s21  ;;  %p2581_p10 = pnand %p2580_p9, %p3362_p0 }
  0xc8   : > { %p2582_p7 = pneg %p2581_p10 }
 0x12e   : > { %v933_v28 = vpop.permute.xlu1 %932 }
 0x132   : > { %v814_v35 = vpop.permute.xlu1 %813 }
 0x144   : > { %v848_v13 = vpop.xlane.xlu0 %847 }
 0x145   : > { %v850_v14 = vmul.f32 0.03125, %v848_v13 }
 0x147   : > { %v851_v15 = vadd.f32 1e-06, %v850_v14 }
 0x148   : > { %v729_v16 = vpop.xlane.xlu0 %728 }
 0x149   : > { %2311 = vrsqrt.f32 %v851_v15  ;;  %v731_v17 = vmul.f32 0.03125, %v729_v16  ;;  %v2695_v15 = vmov -inf   ;;  %v2696_v16 = vmov 0  }
 0x14a   : > { %826 = vst.msk [vmem:[#allocation5] sm:$0xff] %vm825_vm4, %v2695_v15  ;;  %827 = vst.msk [vmem:[#allocation5 + $0x8] sm:$0xff] %vm825_vm4, %v2695_v15  ;;  %2303 = vset.pattern.permute.xlu1 %v2696_v16  ;;  %2304 = vset.pattern.permute.xlu0 %v2696_v16 }
 0x14b   : > { %v732_v18 = vadd.f32 1e-06, %v731_v17  ;;  %828 = vst.msk [vmem:[#allocation5 + $0x10] sm:$0xff] %vm825_vm4, %v2695_v15  ;;  %829 = vst.msk [vmem:[#allocation5 + $0x18] sm:$0xff] %vm825_vm4, %v2695_v15 }
 0x14d   : > { %2313 = vrsqrt.f32 %v732_v18 }
 0x156   : > { %v2312_v19 = vpop.eup %2311 }
 0x157   : > { %v853_v21 = vmul.f32 %v2312_v19, %v843_v0 }
 0x159   : > { %v860_v22 = vmul.f32 %v2039_v20, %v853_v21 }
 0x15a   : > { %v2314_v23 = vpop.eup %2313 }
 0x15b   : > { %v861_v24 = vpack.c.bf16 %v860_v22, %v860_v22  ;;  %v734_v25 = vmul.f32 %v2314_v23, %v3007_v1 }
 0x15d   : > { %2083 = vmatmul.mubr.msk.bf16.vlgmr.msra.gmra.mxu1 %vm726_vm0, %v861_v24  ;;  %v741_v26 = vmul.f32 %v2039_v20, %v734_v25 }
 0x15e   : > { %2094 = vmatprep.mubr.msk.bf16.mxu1 %vm2689_vm1, %v2688_v8 }
 0x15f   : > { %v742_v27 = vpack.c.bf16 %v741_v26, %v741_v26 }
 0x161   : > { %2075 = vmatmul.mubr.msk.bf16.vlgmr.msra.gmra.mxu0 %vm726_vm0, %v742_v27 }
 0x162   : > { %2088 = vmatprep.mubr.msk.bf16.mxu0 %vm2689_vm1, %v2688_v8 }
 0x21d   : > { %v922_v30 = vpop.f32.mrf.mxu1 }
 0x21e   : > { %v3042_v31 = vadd.f32 %v2013_v29, %v922_v30 }
 0x21f   : > { %v2084_v32 = vpop.f32.mrf.mxu1 }
 0x220   : > { %v935_v34 = vmul.f32 %v933_v28, %v3042_v31  ;;  %v929_v45 = vmul.f32 %v928_v44, %v3042_v31  ;;  %v3126_v44 = vld [vmem:[#allocation5 + $0x8] sm:$0xff] }
 0x221   : > { %v803_v36 = vpop.f32.mrf.mxu0  ;;  %v925_v37 = vpop.f32.mrf.mxu1 }
 0x222   : > { %v804_v38 = vadd.f32 %v2009_v33, %v803_v36  ;;  %937 = vrot.lane.b32.xlu0 %v935_v34, %s2691_s14 }
 0x223   : > { %v2076_v39 = vpop.f32.mrf.mxu0  ;;  %v2085_v40 = vpop.f32.mrf.mxu1 }
 0x224   : > { %v816_v41 = vmul.f32 %v814_v35, %v804_v38  ;;  %v810_v50 = vmul.f32 %v809_v47, %v804_v38  ;;  %v3114_v39 = vld [vmem:[#allocation5] sm:$0xff] }
 0x225   : > { %v806_v42 = vpop.f32.mrf.mxu0 }
 0x226   : > { %818 = vrot.lane.b32.xlu1 %v816_v41, %s2691_s14  ;;  %s2583_s14 = sshll.u32 %s2698_s4, 4  ;;  %s2584_s14 = int_to_ptr.vmem [resolvable:$false] %s2583_s14 }
 0x227   : > { %v2077_v43 = vpop.f32.mrf.mxu0  ;;  %p2586_p13 = scmp.lt.s32.totalorder %s3233_s11, %s2584_s14 }
 0x228   : > { %v2038_v43 = vpack.c.bf16 %v3042_v31, %v3042_v31 }
 0x294   : > { %v938_v46 = vpop.permute.xlu0 %937 }
 0x295   : > { %v940_v48 = vadd.f32 %v938_v46, %v929_v45 }
 0x297   : > { %v941_v49 = vpack.c.bf16 %v940_v48, %v940_v48  ;;  %v3136_v48 = vld [vmem:[#allocation5 + $0x10] sm:$0xff] }
 0x298   : > { %v819_v51 = vpop.permute.xlu1 %818 }
 0x299   : > { %945 = vst.msk [vmem:[#allocation3] sm:$0xf] %vm823_vm3, %v941_v49  ;;  %v821_v52 = vadd.f32 %v819_v51, %v810_v50 }
 0x29b   : > { %v822_v53 = vpack.c.bf16 %v821_v52, %v821_v52  ;;  %v3147_v52 = vld [vmem:[#allocation5 + $0x18] sm:$0xff] }
 0x29d   : > { %824 = vst.msk [vmem:[#allocation2] sm:$0xf] %vm823_vm3, %v822_v53 }
 0x2a0   : > { %v959_v54 = vld [vmem:[#allocation3] sm:$0xf] }
 0x2a1   : > { %v970_v55 = vsel %vm834_vm2, %v959_v54, 0  ;;  %v2021_v56 = vcombine.low %v959_v54, %v959_v54 }
 0x2a2   : > { %2087 = vmatpush3.bf16.xpose.msra.mxu0 %v970_v55 }
 0x2a3   : > { %1104 = vrot.lane.b32.xlu1 %v2021_v56, %s2692_s9  ;;  %2098 = vmatprep.subr.bf16.mxu0 %v2688_v8 }
 0x2a4   : > { %v956_v57 = vld [vmem:[#allocation2] sm:$0xf] }
 0x2a5   : > { %v2020_v58 = vcombine.low %v956_v57, %v956_v57 }
 0x2a7   : > { %1379 = vrot.lane.b32.xlu0 %v2020_v58, %s2693_s20  ;;  %1099 = vrot.lane.b32.xlu1 %v2020_v58, %s2692_s9 }
 0x2a9   : > { %2089 = vmatmul.mubr.msk.bf16.vlgmr.msra.gmra.mxu0 %vm834_vm2, %v956_v57 }
 0x2aa   : > { %2100 = vmatprep.mubr.msk.bf16.mxu0 %vm2689_vm1, %v2688_v8 }
 0x2ab   : > { %1244 = vrot.lane.b32.xlu1 %v2021_v56, %s2694_s26 }
 0x2af   : > { %1242 = vrot.lane.b32.xlu1 %v2020_v58, %s2694_s26 }
 0x2b3   : > { %1381 = vrot.lane.b32.xlu1 %v2021_v56, %s2693_s20 }
 0x315   : > { %v1105_v59 = vpop.permute.xlu1 %1104 }
 0x316   : > { %v1110_v60 = vsel %vm834_vm2, %v1105_v59, 0 }
 0x317   : > { %2099 = vmatpush3.bf16.xpose.msra.mxu0 %v1110_v60 }
 0x318   : > { %2110 = vmatprep.subr.bf16.mxu0 %v2688_v8 }
 0x319   : > { %v1100_v61 = vpop.permute.xlu1 %1099  ;;  %v1380_v4 = vpop.permute.xlu0 %1379 }
 0x31d   : > { %v1245_v62 = vpop.permute.xlu1 %1244 }
 0x31e   : > { %v1250_v63 = vsel %vm834_vm2, %v1245_v62, 0  ;;  %2101 = vmatmul.mubr.msk.bf16.vlgmr.msra.gmra.mxu0 %vm834_vm2, %v1100_v61 }
 0x31f   : > { %2111 = vmatpush3.bf16.xpose.msra.mxu0 %v1250_v63  ;;  %2112 = vmatprep.mubr.msk.bf16.mxu0 %vm2689_vm1, %v2688_v8 }
 0x320   : > { %2122 = vmatprep.subr.bf16.mxu0 %v2688_v8 }
 0x321   : > { %v1243_v0 = vpop.permute.xlu1 %1242 }
 0x325   : > { %v1382_v2 = vpop.permute.xlu1 %1381 }
 0x326   : > { %v1387_v3 = vsel %vm834_vm2, %v1382_v2, 0  ;;  %2113 = vmatmul.mubr.msk.bf16.vlgmr.msra.gmra.mxu0 %vm834_vm2, %v1243_v0 }
 0x327   : > { %2123 = vmatpush3.bf16.xpose.msra.mxu0 %v1387_v3  ;;  %2124 = vmatprep.mubr.msk.bf16.mxu0 %vm2689_vm1, %v2688_v8 }
 0x328   : > { %2134 = vmatprep.subr.bf16.mxu0 %v2688_v8 }
 0x32e   : > { %2125 = vmatmul.mubr.msk.bf16.vlgmr.msra.gmra.mxu0 %vm834_vm2, %v1380_v4 }
 0x32f   : > { %2136 = vmatprep.mubr.msk.bf16.mxu0 %vm2689_vm1, %v2688_v8 }
 0x369   : > { %v1006_v7 = vpop.f32.mrf.mxu0 }
 0x36a   : > { %v1012_v9 = vmul.f32 0.35355338, %v1006_v7 }
 0x36b   : > { %v2090_v10 = vpop.f32.mrf.mxu0 }
 0x36c   : > { %v3086_v11 = vadd.f32 %v1012_v9, %v964_v6 }
 0x36d   : > { %v1009_v12 = vpop.f32.mrf.mxu0 }
 0x36e   : > { %v1015_v13 = vsel %vm834_vm2, %v3086_v11, -inf }
 0x36f   : > { %1016 = vmax.xlane.f32.xlu1 %v1015_v13  ;;  %v2091_v14 = vpop.f32.mrf.mxu0 }
 0x3de   : > { %v1146_v17 = vpop.f32.mrf.mxu0 }
 0x3df   : > { %v1152_v18 = vmul.f32 0.35355338, %v1146_v17 }
 0x3e0   : > { %v2102_v19 = vpop.f32.mrf.mxu0 }
 0x3e1   : > { %v3102_v20 = vadd.f32 %v1152_v18, %v964_v6 }
 0x3e2   : > { %v1149_v21 = vpop.f32.mrf.mxu0 }
 0x3e3   : > { %v1156_v22 = vsel %vm834_vm2, %v3102_v20, -inf }
 0x3e4   : > { %1157 = vmax.xlane.f32.xlu0 %v1156_v22  ;;  %v2103_v23 = vpop.f32.mrf.mxu0 }
 0x3e6   : > { %v1286_v24 = vpop.f32.mrf.mxu0 }
 0x3e7   : > { %v1292_v25 = vmul.f32 0.35355338, %v1286_v24 }
 0x3e8   : > { %v2114_v26 = vpop.f32.mrf.mxu0 }
 0x3e9   : > { %v3106_v27 = vadd.f32 %v1292_v25, %v964_v6 }
 0x3ea   : > { %v1289_v28 = vpop.f32.mrf.mxu0 }
 0x3eb   : > { %v1296_v29 = vsel %vm834_vm2, %v3106_v27, -inf }
 0x3ec   : > { %1297 = vmax.xlane.f32.xlu0 %v1296_v29  ;;  %v2115_v30 = vpop.f32.mrf.mxu0  ;;  %v1030_v29 = vld [vmem:[#allocation6] sm:$0xff] }
 0x3ee   : > { %v1423_v32 = vpop.f32.mrf.mxu0 }
 0x3ef   : > { %v1429_v33 = vmul.f32 0.35355338, %v1423_v32 }
 0x3f0   : > { %v2126_v34 = vpop.f32.mrf.mxu0 }
 0x3f1   : > { %v3110_v35 = vadd.f32 %v1429_v33, %v964_v6 }
 0x3f2   : > { %v1426_v36 = vpop.f32.mrf.mxu0 }
 0x3f3   : > { %v1433_v37 = vsel %vm834_vm2, %v3110_v35, -inf }
 0x3f4   : > { %1434 = vmax.xlane.f32.xlu1 %v1433_v37  ;;  %v2127_v38 = vpop.f32.mrf.mxu0  ;;  %v1538_v37 = vld [vmem:[#allocation22] sm:$0xf] }
 0x3f5   : > { %v1543_v38 = vsel %vm1049_vm5, %v1538_v37, 0 }
 0x3f6   : > { %2135 = vmatpush3.bf16.msra.mxu0 %v1543_v38 }
 0x3f7   : > { %2146 = vmatprep.subr.bf16.mxu0 %v2688_v8 }
 0x3f8   : > { %v1017_v40 = vpop.xlane.xlu1 %1016 }
 0x3f9   : > { %v3117_v41 = vmax.f32 %v3114_v39, %v1017_v40 }
 0x3fb   : > { %v1019_v42 = vsub.f32 %v3114_v39, %v3117_v41  ;;  %1095 = vst.msk [vmem:[#allocation5] sm:$0xff] %vm825_vm4, %v3117_v41 }
 0x402   : > { %950 = vrot.lane.b32.xlu0 %v2038_v43, %s2697_s23 }
 0x405   : > { %1024 = vperm.xlu1 %2303, %v3117_v41  }
 0x46d   : > { %v1158_v45 = vpop.xlane.xlu0 %1157 }
 0x46e   : > { %v3129_v46 = vmax.f32 %v3126_v44, %v1158_v45  ;;  %v1172_v45 = vld [vmem:[#allocation6 + $0x8] sm:$0xff] }
 0x470   : > { %v1160_v47 = vsub.f32 %v3126_v44, %v3129_v46  ;;  %1241 = vst.msk [vmem:[#allocation5 + $0x8] sm:$0xff] %vm825_vm4, %v3129_v46  ;;  %1165 = vperm.xlu1 %2303, %v3129_v46  }
 0x472   : > { %v1161_v33 = vmul.f32 1.442695, %v1160_v47 }
 0x475   : > { %v1298_v31 = vpop.xlane.xlu0 %1297 }
 0x476   : > { %v3139_v49 = vmax.f32 %v3136_v48, %v1298_v31 }
 0x478   : > { %v1300_v50 = vsub.f32 %v3136_v48, %v3139_v49  ;;  %1378 = vst.msk [vmem:[#allocation5 + $0x10] sm:$0xff] %vm825_vm4, %v3139_v49  ;;  %1305 = vperm.xlu0 %2304, %v3139_v49   ;;  %v1449_v49 = vld [vmem:[#allocation6 + $0x18] sm:$0xff] }
 0x479   : > { %v951_v51 = vpop.permute.xlu0 %950 }
 0x47a   : > { %955 = vst.msk [vmem:[#allocation4] sm:$0xf] %vm823_vm3, %v951_v51  ;;  %v1301_v43 = vmul.f32 1.442695, %v1300_v50 }
 0x47d   : > { %v1435_v53 = vpop.xlane.xlu1 %1434 }
 0x47e   : > { %v3150_v54 = vmax.f32 %v3147_v52, %v1435_v53  ;;  %v1312_v53 = vld [vmem:[#allocation6 + $0x10] sm:$0xff] }
 0x480   : > { %v1437_v55 = vsub.f32 %v3147_v52, %v3150_v54  ;;  %1515 = vst.msk [vmem:[#allocation5 + $0x18] sm:$0xff] %vm825_vm4, %v3150_v54  ;;  %1442 = vperm.xlu1 %2303, %v3150_v54  }
 0x481   : > { %v1025_v56 = vpop.permute.xlu1 %1024  ;;  %v962_v57 = vld [vmem:[#allocation4] sm:$0xf] }
 0x482   : > { %v1027_v58 = vsub.f32 %v3086_v11, %v1025_v56  ;;  %v1051_v59 = vsel %vm1049_vm5, %v962_v57, 0  ;;  %v2023_v60 = vcombine.low %v962_v57, %v962_v57  ;;  %v1438_v44 = vmul.f32 1.442695, %v1437_v55 }
 0x483   : > { %2093 = vmatpush3.bf16.msra.mxu1 %v1051_v59 }
 0x484   : > { %v1028_v61 = vmul.f32 1.442695, %v1027_v58  ;;  %1328 = vrot.lane.b32.xlu0 %v2023_v60, %s2694_s26  ;;  %1191 = vrot.lane.b32.xlu1 %v2023_v60, %s2692_s9  ;;  %s2585_s9 = scalar_lea.vmem %s2584_s14, 256 }
 0x485   : > { %2104 = vmatprep.subr.bf16.mxu1 %v2688_v8  ;;  %p2587_p4 = scmp.lt.s32.totalorder %s2585_s9, %s2579_s25 }
 0x486   : > { %2315 = vpow2.f32 %v1028_v61 }
 0x487   : > { %p2588_p11 = por %p2587_p4, %p2586_p13 }
 0x488   : > { %1465 = vrot.lane.b32.xlu1 %v2023_v60, %s2693_s20  ;;  %v1597_v60 = vld [vmem:[#allocation22 + $0x4] sm:$0xf] }
 0x489   : > { %v1602_v61 = vsel %vm1049_vm5, %v1597_v60, 0  ;;  %p2589_p12 = pnand %p2588_p11, %p2582_p7 }
 0x493   : > { %v2316_v62 = vpop.eup %2315 }
 0x494   : > { %v1045_v63 = vpack.c.bf16 %v2316_v62, %v2316_v62  ;;  %v1032_v0 = vsel %vm834_vm2, %v2316_v62, 0.0 }
 0x496   : > { %2095 = vmatmul.mubr.msk.bf16.vlgmr.msra.gmra.mxu1 %vm834_vm2, %v1045_v63 }
 0x497   : > { %2106 = vmatprep.mubr.msk.bf16.mxu1 %vm2689_vm1, %v2688_v8 }
 0x4a3   : > { %1033 = vadd.xlane.f32.xlu0 %v1032_v0  ;;  %v1038_v0 = vld [vmem:[#allocation7] sm:$0xff] }
 0x4eb   : > { %v1166_v2 = vpop.permute.xlu1 %1165 }
 0x4ec   : > { %v1168_v3 = vsub.f32 %v3102_v20, %v1166_v2 }
 0x4ee   : > { %v1169_v4 = vmul.f32 1.442695, %v1168_v3 }
 0x4f0   : > { %2317 = vpow2.f32 %v1169_v4 }
 0x4f3   : > { %v1306_v5 = vpop.permute.xlu0 %1305 }
 0x4f4   : > { %v1308_v6 = vsub.f32 %v3106_v27, %v1306_v5  ;;  %v1020_v27 = vmul.f32 1.442695, %v1019_v42  ;;  %v1180_v5 = vld [vmem:[#allocation7 + $0x8] sm:$0xff] }
 0x4f6   : > { %v1309_v7 = vmul.f32 1.442695, %v1308_v6 }
 0x4f7   : > { %v1329_v16 = vpop.permute.xlu0 %1328 }
 0x4f8   : > { %2319 = vpow2.f32 %v1309_v7  ;;  %v1334_v18 = vsel %vm1049_vm5, %v1329_v16, 0 }
 0x4fb   : > { %v1443_v9 = vpop.permute.xlu1 %1442 }
 0x4fc   : > { %v1445_v10 = vsub.f32 %v3110_v35, %v1443_v9 }
 0x4fd   : > { %v2318_v11 = vpop.eup %2317 }
 0x4fe   : > { %v1446_v12 = vmul.f32 1.442695, %v1445_v10  ;;  %v1174_v13 = vsel %vm834_vm2, %v2318_v11, 0.0  ;;  %v1187_v17 = vpack.c.bf16 %v2318_v11, %v2318_v11  ;;  %v1656_v10 = vld [vmem:[#allocation22 + $0x8] sm:$0xf] }
 0x4ff   : > { %1175 = vadd.xlane.f32.xlu1 %v1174_v13  ;;  %v1192_v14 = vpop.permute.xlu1 %1191  ;;  %v1661_v16 = vsel %vm1049_vm5, %v1656_v10, 0 }
 0x500   : > { %2321 = vpow2.f32 %v1446_v12  ;;  %v1197_v15 = vsel %vm1049_vm5, %v1192_v14, 0 }
 0x501   : > { %2105 = vmatpush3.bf16.msra.mxu1 %v1197_v15  ;;  %2323 = vpow2.f32 %v1020_v27 }
 0x502   : > { %2116 = vmatprep.subr.bf16.mxu1 %v2688_v8  ;;  %2325 = vpow2.f32 %v1161_v33 }
 0x503   : > { %v1466_v21 = vpop.permute.xlu1 %1465  ;;  %2327 = vpow2.f32 %v1301_v43 }
 0x504   : > { %2107 = vmatmul.mubr.msk.bf16.vlgmr.msra.gmra.mxu1 %vm834_vm2, %v1187_v17  ;;  %v1471_v23 = vsel %vm1049_vm5, %v1466_v21, 0  ;;  %2329 = vpow2.f32 %v1438_v44 }
 0x505   : > { %v2320_v19 = vpop.eup %2319  ;;  %2117 = vmatpush3.bf16.msra.mxu1 %v1334_v18  ;;  %2118 = vmatprep.mubr.msk.bf16.mxu1 %vm2689_vm1, %v2688_v8 }
 0x506   : > { %v1314_v20 = vsel %vm834_vm2, %v2320_v19, 0.0  ;;  %2128 = vmatprep.subr.bf16.mxu1 %v2688_v8  ;;  %v1327_v22 = vpack.c.bf16 %v2320_v19, %v2320_v19 }
 0x507   : > { %1315 = vadd.xlane.f32.xlu0 %v1314_v20 }
 0x50c   : > { %2119 = vmatmul.mubr.msk.bf16.vlgmr.msra.gmra.mxu1 %vm834_vm2, %v1327_v22 }
 0x50d   : > { %v2322_v24 = vpop.eup %2321  ;;  %2129 = vmatpush3.bf16.msra.mxu1 %v1471_v23  ;;  %2130 = vmatprep.mubr.msk.bf16.mxu1 %vm2689_vm1, %v2688_v8 }
 0x50e   : > { %v1451_v25 = vsel %vm834_vm2, %v2322_v24, 0.0  ;;  %2140 = vmatprep.subr.bf16.mxu1 %v2688_v8  ;;  %v1464_v26 = vpack.c.bf16 %v2322_v24, %v2322_v24  ;;  %v2324_v28 = vpop.eup %2323 }
 0x50f   : > { %1452 = vadd.xlane.f32.xlu0 %v1451_v25  ;;  %v1031_v30 = vmul.f32 %v2324_v28, %v1030_v29  ;;  %v2326_v36 = vpop.eup %2325 }
 0x510   : > { %v1173_v46 = vmul.f32 %v2326_v36, %v1172_v45  ;;  %v2328_v51 = vpop.eup %2327 }
 0x511   : > { %v1313_v56 = vmul.f32 %v2328_v51, %v1312_v53  ;;  %v2330_v48 = vpop.eup %2329 }
 0x512   : > { %v1450_v50 = vmul.f32 %v2330_v48, %v1449_v49 }
 0x514   : > { %2131 = vmatmul.mubr.msk.bf16.vlgmr.msra.gmra.mxu1 %vm834_vm2, %v1464_v26 }
 0x515   : > { %2142 = vmatprep.mubr.msk.bf16.mxu1 %vm2689_vm1, %v2688_v8  ;;  %2141 = vmatpush3.bf16.msra.mxu1 %v1602_v61 }
 0x516   : > { %2152 = vmatprep.subr.bf16.mxu1 %v2688_v8 }
 0x52c   : > { %v1034_v32 = vpop.xlane.xlu0 %1033 }
 0x52d   : > { %v1035_v34 = vadd.f32 %v1034_v32, %v1031_v30  ;;  %v1320_v30 = vld [vmem:[#allocation7 + $0x10] sm:$0xff] }
 0x52f   : > { %1037 = vst.msk [vmem:[#allocation6] sm:$0xff] %vm825_vm4, %v1035_v34 }
 0x536   : > { %v1529_v35 = vld [vmem:[#allocation6] sm:$0xff] }
 0x537   : > { %1532 = vperm.xlu1 %2303, %v1529_v35  }
 0x53b   : > { %1041 = vperm.xlu1 %2303, %v2324_v28  }
 0x53f   : > { %1183 = vperm.xlu1 %2303, %v2326_v36   ;;  %v1715_v36 = vld [vmem:[#allocation22 + $0xc] sm:$0xf] }
 0x556   : > { %v1087_v39 = vpop.f32.mrf.mxu1 }
 0x558   : > { %v2096_v40 = vpop.f32.mrf.mxu1 }
 0x55a   : > { %v1090_v41 = vpop.f32.mrf.mxu1 }
 0x55b   : > { %v1720_v41 = vsel %vm1049_vm5, %v1715_v36, 0 }
 0x55c   : > { %v2097_v42 = vpop.f32.mrf.mxu1 }
 0x55d   : > { %v1457_v42 = vld [vmem:[#allocation7 + $0x18] sm:$0xff] }
 0x588   : > { %v1176_v47 = vpop.xlane.xlu1 %1175 }
 0x589   : > { %v1177_v31 = vadd.f32 %v1176_v47, %v1173_v46 }
 0x58b   : > { %1178 = vst.msk [vmem:[#allocation6 + $0x8] sm:$0xff] %vm825_vm4, %v1177_v31 }
 0x590   : > { %v1316_v57 = vpop.xlane.xlu0 %1315 }
 0x591   : > { %v1317_v58 = vadd.f32 %v1316_v57, %v1313_v56 }
 0x592   : > { %v1587_v59 = vld [vmem:[#allocation6 + $0x8] sm:$0xff] }
 0x593   : > { %1318 = vst.msk [vmem:[#allocation6 + $0x10] sm:$0xff] %vm825_vm4, %v1317_v58  ;;  %1590 = vperm.xlu0 %2304, %v1587_v59  }
 0x598   : > { %v1453_v52 = vpop.xlane.xlu0 %1452 }
 0x599   : > { %v1454_v54 = vadd.f32 %v1453_v52, %v1450_v50 }
 0x59a   : > { %v1646_v55 = vld [vmem:[#allocation6 + $0x10] sm:$0xff] }
 0x59b   : > { %1455 = vst.msk [vmem:[#allocation6 + $0x18] sm:$0xff] %vm825_vm4, %v1454_v54  ;;  %1649 = vperm.xlu0 %2304, %v1646_v55   ;;  %v2029_v55 = vld [vmem:[%s3359_s19] ss:$0 sm:$0xff] }
 0x59c   : > { %v1527_v61 = vadd.f32 %v2029_v55, %v3007_v1 }
 0x59f   : > { %1323 = vperm.xlu0 %2304, %v2328_v51  }
 0x5a2   : > { %v1705_v62 = vld [vmem:[#allocation6 + $0x18] sm:$0xff] }
 0x5a3   : > { %1708 = vperm.xlu1 %2303, %v1705_v62  }
 0x5a7   : > { %1460 = vperm.xlu1 %2303, %v2330_v48  }
 0x5b2   : > { %v1533_v63 = vpop.permute.xlu1 %1532 }
 0x5b3   : > { %2331 = vrcp.f32 %v1533_v63 }
 0x5b6   : > { %v1042_v2 = vpop.permute.xlu1 %1041 }
 0x5b7   : > { %v1044_v3 = vmul.f32 %v1042_v2, %v1038_v0 }
 0x5b9   : > { %v1093_v4 = vadd.f32 %v1087_v39, %v1044_v3 }
 0x5ba   : > { %v1184_v6 = vpop.permute.xlu1 %1183 }
 0x5bb   : > { %1094 = vst.msk [vmem:[#allocation7] sm:$0xff] %vm834_vm2, %v1093_v4  ;;  %v1186_v11 = vmul.f32 %v1184_v6, %v1180_v5 }
 0x5c0   : > { %v2332_v7 = vpop.eup %2331 }
 0x5c2   : > { %v1528_v9 = vld [vmem:[#allocation7] sm:$0xff] }
 0x5c3   : > { %v1536_v12 = vmul.f32 %v2332_v7, %v1528_v9 }
 0x5c4   : > { %v1233_v13 = vpop.f32.mrf.mxu1 }
 0x5c5   : > { %v1239_v14 = vadd.f32 %v1233_v13, %v1186_v11  ;;  %v1537_v15 = vpack.c.bf16 %v1536_v12, %v1536_v12 }
 0x5c6   : > { %v2108_v17 = vpop.f32.mrf.mxu1 }
 0x5c7   : > { %1240 = vst.msk [vmem:[#allocation7 + $0x8] sm:$0xff] %vm834_vm2, %v1239_v14  ;;  %2137 = vmatmul.mubr.msk.bf16.vlgmr.msra.gmra.mxu0 %vm834_vm2, %v1537_v15 }
 0x5c8   : > { %v1236_v18 = vpop.f32.mrf.mxu1  ;;  %2147 = vmatpush3.bf16.msra.mxu0 %v1661_v16  ;;  %2148 = vmatprep.mubr.msk.bf16.mxu0 %vm2689_vm1, %v2688_v8 }
 0x5ca   : > { %v2109_v19 = vpop.f32.mrf.mxu1 }
 0x5cc   : > { %v1370_v20 = vpop.f32.mrf.mxu1 }
 0x5ce   : > { %v2120_v21 = vpop.f32.mrf.mxu1  ;;  %v1586_v35 = vld [vmem:[#allocation7 + $0x8] sm:$0xff] }
 0x5d0   : > { %v1373_v22 = vpop.f32.mrf.mxu1 }
 0x5d2   : > { %v2121_v23 = vpop.f32.mrf.mxu1 }
 0x5d4   : > { %v1507_v24 = vpop.f32.mrf.mxu1 }
 0x5d6   : > { %v2132_v25 = vpop.f32.mrf.mxu1 }
 0x5d8   : > { %v1510_v26 = vpop.f32.mrf.mxu1 }
 0x5da   : > { %v2133_v27 = vpop.f32.mrf.mxu1 }
 0x60e   : > { %v1591_v28 = vpop.permute.xlu0 %1590 }
 0x60f   : > { %2333 = vrcp.f32 %v1591_v28 }
 0x616   : > { %v1650_v29 = vpop.permute.xlu0 %1649 }
 0x617   : > { %2335 = vrcp.f32 %v1650_v29 }
 0x61a   : > { %v1324_v32 = vpop.permute.xlu0 %1323 }
 0x61b   : > { %v1326_v33 = vmul.f32 %v1324_v32, %v1320_v30 }
 0x61c   : > { %v2334_v34 = vpop.eup %2333 }
 0x61d   : > { %v1376_v37 = vadd.f32 %v1370_v20, %v1326_v33  ;;  %v1594_v38 = vmul.f32 %v2334_v34, %v1586_v35 }
 0x61e   : > { %v1709_v39 = vpop.permute.xlu1 %1708 }
 0x61f   : > { %1377 = vst.msk [vmem:[#allocation7 + $0x10] sm:$0xff] %vm834_vm2, %v1376_v37  ;;  %v1595_v40 = vpack.c.bf16 %v1594_v38, %v1594_v38  ;;  %2337 = vrcp.f32 %v1709_v39 }
 0x621   : > { %2143 = vmatmul.mubr.msk.bf16.vlgmr.msra.gmra.mxu1 %vm834_vm2, %v1595_v40 }
 0x622   : > { %v1461_v43 = vpop.permute.xlu1 %1460  ;;  %2153 = vmatpush3.bf16.msra.mxu1 %v1720_v41  ;;  %2154 = vmatprep.mubr.msk.bf16.mxu1 %vm2689_vm1, %v2688_v8 }
 0x623   : > { %v1463_v44 = vmul.f32 %v1461_v43, %v1457_v42 }
 0x624   : > { %v2336_v46 = vpop.eup %2335 }
 0x625   : > { %v1513_v45 = vadd.f32 %v1507_v24, %v1463_v44 }
 0x626   : > { %v1645_v47 = vld [vmem:[#allocation7 + $0x10] sm:$0xff] }
 0x627   : > { %1514 = vst.msk [vmem:[#allocation7 + $0x18] sm:$0xff] %vm834_vm2, %v1513_v45  ;;  %v1653_v31 = vmul.f32 %v2336_v46, %v1645_v47 }
 0x629   : > { %v1654_v51 = vpack.c.bf16 %v1653_v31, %v1653_v31 }
 0x62b   : > { %2149 = vmatmul.mubr.msk.bf16.vlgmr.msra.gmra.mxu0 %vm834_vm2, %v1654_v51 }
 0x62c   : > { %v2338_v53 = vpop.eup %2337 }
 0x62e   : > { %v1704_v56 = vld [vmem:[#allocation7 + $0x18] sm:$0xff] }
 0x62f   : > { %v1712_v57 = vmul.f32 %v2338_v53, %v1704_v56 }
 0x631   : > { %v1713_v58 = vpack.c.bf16 %v1712_v57, %v1712_v57 }
 0x633   : > { %2155 = vmatmul.mubr.msk.bf16.vlgmr.msra.gmra.mxu1 %vm834_vm2, %v1713_v58 }
 0x687   : > { %v1579_v59 = vpop.f32.mrf.mxu0 }
 0x688   : > { %v1585_v0 = vadd.f32 %v1579_v59, %v1527_v61 }
 0x689   : > { %v2138_v48 = vpop.f32.mrf.mxu0 }
 0x68b   : > { %v1582_v8 = vpop.f32.mrf.mxu0 }
 0x68d   : > { %v2139_v49 = vpop.f32.mrf.mxu0 }
 0x6e1   : > { %v1638_v50 = vpop.f32.mrf.mxu1 }
 0x6e2   : > { %v1644_v3 = vadd.f32 %v1638_v50, %v1585_v0 }
 0x6e3   : > { %v2144_v52 = vpop.f32.mrf.mxu1 }
 0x6e5   : > { %v1641_v54 = vpop.f32.mrf.mxu1 }
 0x6e7   : > { %v2145_v60 = vpop.f32.mrf.mxu1 }
 0x6eb   : > { %v1697_v62 = vpop.f32.mrf.mxu0 }
 0x6ec   : > { %v1703_v5 = vadd.f32 %v1697_v62, %v1644_v3 }
 0x6ed   : > { %v2150_v63 = vpop.f32.mrf.mxu0 }
 0x6ef   : > { %v1700_v2 = vpop.f32.mrf.mxu0 }
 0x6f1   : > { %v2151_v4 = vpop.f32.mrf.mxu0 }
 0x6f3   : > { %v1756_v6 = vpop.f32.mrf.mxu1 }
 0x6f4   : > { %v1762_v7 = vadd.f32 %v1756_v6, %v1703_v5 }
 0x6f5   : > { %v2156_v1 = vpop.f32.mrf.mxu1 }
 0x6f6   : > { %1764 = vst.msk [vmem:[%s711_s15] sm:$0xff] %vm726_vm0, %v1762_v7 }
 0x6f7   : > { %v1759_v9 = vpop.f32.mrf.mxu1 }
 0x6f8   : > { %2592 = shalt.err (!%p2589_p12)
}
 0x6f9   : > { %s2593_s20 = scalar_lea.hbm %s3231_s16, 128  ;;  %s2597_s23 = scalar_lea.hbm %s3361_s22, 256 }
 0x6fa   : > { %p2594_p5 = scmp.ne.s32.totalorder %s3231_s16, %s2593_s20  ;;  %p2598_p1 = scmp.lt.s32.totalorder %s3231_s16, %s3361_s22 }
 0x6fb   : > { %p2599_p3 = scmp.lt.s32.totalorder %s2597_s23, %s2593_s20 }
 0x6fc   : > { %p2595_p6 = pnand %p2594_p5, %p3362_p0 }
 0x6fd   : > { %p2600_p8 = por %p2599_p3, %p2598_p1 }
 0x6fe   : > { %p2596_p2 = pneg %p2595_p6 }
 0x700   : > { %p2601_p9 = pnand %p2600_p8, %p2596_p2 }
 0x702   : > { %2604 = shalt.err (!%p2601_p9)
}
 0x703   : > { %2188 = dma.vmem_to_hbm [thread:$0]  (%p3362_p0), %s3233_s11, 128, %s3231_s16, %s1766_s18   ;;  %v2157_v10 = vpop.f32.mrf.mxu1 }
 0x704 PF: > { %s3363_s6 = sld [smem:[#allocation30_spill]] }
 0x705   : > { %s3364_s19 = sld [smem:[#allocation37_spill]] }
 0x706   : > { %s3365_s21 = sld [smem:[#allocation33_spill]] }
 0x70a   : > { %s1792_s15 = sand.u32 1, %s3363_s6  }
 0x70b   : > { %p3366_p10 = scmp.ne.s32.totalorder %s3364_s19, 0  ;;  %s1793_s28 = scalar_lea.sflag [#allocation10], %s1792_s15 }
 0x70c   : > { %p3367_p7 = scmp.ge.s32.totalorder %s3365_s21, 2 }
 0x70e   : > { %p2220_p13 = pnand %p3367_p7, %p3366_p10 }
 0x710   : > { %p2221_p4 = pneg %p2220_p13 }
 0x712   : > { %2650 = dma.done.wait (%p2221_p4), %s1793_s28, 128  }
 0x713   : > { %2652 = vsyncadd (%p2221_p4), %s1793_s28, 4294967168  ;;  %s36_s18 = sadd.s32 1, %s3365_s21   ;;  %s3368_s8 = sld [smem:[#allocation31_spill]] }
 0x714   : > { %p33_p11 = scmp.ge.s32.totalorder %s36_s18, 4   ;;  %s3369_s15 = sld [smem:[#allocation36_spill]] }
 0x715   : > { %s3370_s11 = sld [smem:[#allocation34_spill]]  ;;  %s3371_s29 = smov %s2659_s30 }
 0x716   : > { %s3373_s16 = smov %s2671_s17 }
 0x717   :  { %35 = sbr.rel (!%p33_p11) target bundleno = 19 (0x13), region = 201 }
 0x719   : > { %s3372_s30 = smov %s3368_s8 }
 0x71b   : > { %s3374_s17 = smov %s3370_s11 }
 0x71c   :  { %1798 = vsyncpa [#allocation9], 1 }
 0x71d   :  { %1800 = vsyncpa [#allocation9 + $0x1], 1 }
 0x71e   :  { %1801 = vsyncpa [#allocation12], 1 }
 0x71f   :  { %1803 = vsyncpa [#allocation12 + $0x1], 1 }
 0x720   :  { %1804 = vsyncpa [#allocation15], 1 }
 0x721   :  { %1805 = vsyncpa [#allocation18], 1 }
 0x722   :  { %1806 = vsyncpa [#allocation21], 1 }
 0x723   :  { %1807 = vsyncpa [#allocation10], 1 }
 0x724   :  { %1809 = vsyncpa [#allocation10 + $0x1], 1 }

</bundles_post_ra>
